<compile_context>
chip_gen: v7x
topology: tpu7x:2x2x1
jax: 0.10.0
libtpu: 0.0.40
codegen_flags: <defaults>
</compile_context>

<pallas_src>
import functools

import jax
import jax.numpy as jnp
from jax import lax
from jax.experimental import pallas as pl
from jax.experimental.pallas import tpu as pltpu

NEG_SLOPE = 0.2                 # PyG GATConv default LeakyReLU slope
NEG_INF = -1e30
TILE_DST = 256                  # dst-node tile of the attention kernel
TILE_SRC = 512                  # src-node tile (multiple of TILE_DST)
TILE_PROJ = 512                 # row tile of the projection kernel
OUT_LANES = 128                 # lane-dense output slab width
VMEM_LIMIT = 32 * 1024 * 1024   # safe on v5e/v6e (128 MiB) and v7x (64 MiB)


def _elu(x):
    return jnp.where(x > 0, x, jnp.exp(jnp.minimum(x, 0.0)) - 1.0)


def _softmax_dtype():
    """bf16 elementwise/exp on bf16-native VPU/EUP chips (v6e/v7x); f32 otherwise."""
    try:
        kind = jax.devices()[0].device_kind.lower()
    except Exception:
        return jnp.float32
    for old in ("v2", "v3", "v4", "v5"):
        if old in kind:
            return jnp.float32
    return jnp.bfloat16


# ---------------------------------------------------------------------------
# Kernel 1: per-node projection (fused over heads) + attention scalar precompute
# ---------------------------------------------------------------------------
def _proj_kernel(x_ref, w_ref, adst_mat_ref, asrc_mat_t_ref,
                 hfeat_ref, adst_ref, asrct_ref):
    x = x_ref[...].astype(jnp.bfloat16)                       # bf16 into the MXU
    w = w_ref[...].astype(jnp.bfloat16)
    y = jnp.dot(x, w, preferred_element_type=jnp.float32)     # (TP, H*C), one fused matmul
    hfeat_ref[...] = y.astype(hfeat_ref.dtype)                 # bf16 node features

    # alpha_dst[n, h] = sum_c y[n, h*C+c] * att_dst[h, c]
    adst_ref[...] = jnp.dot(y, adst_mat_ref[...], preferred_element_type=jnp.float32)

    # alpha_src^T[h, n]  (source axis on lanes; attention kernel never transposes)
    asrct_ref[...] = lax.dot_general(
        asrc_mat_t_ref[...], y, (((1,), (1,)), ((), ())),
        preferred_element_type=jnp.float32)                    # (H, TP)


# ---------------------------------------------------------------------------
# Kernel 2: masked attention with online softmax over src-node blocks
# ---------------------------------------------------------------------------
def _attn_kernel(nonempty_ref, jmap_ref, adst_ref, asrct_ref, adj_ref, hfeat_ref,
                 bias_ref, out_ref, m_s, l_s, acc_s,
                 *, heads, out_ch, concat, apply_elu, out_w, sm_dtype):
    i = pl.program_id(0)
    j = pl.program_id(1)

    @pl.when(j == 0)
    def _init():
        m_s[...] = jnp.full_like(m_s, NEG_INF)
        l_s[...] = jnp.zeros_like(l_s)
        acc_s[...] = jnp.zeros_like(acc_s)

    # Skip all-masked (dst, src) blocks entirely: no exp/max/MXU work.  For
    # skipped blocks the adj/hfeat tiles in VMEM are stale (remapped index)
    # but never read.
    @pl.when(nonempty_ref[i, j] != 0)
    def _compute():
        mask = adj_ref[...] != 0                               # (TQ, TS) exact int8 compare
        hsrc = hfeat_ref[...]                                  # (TS, H*C) bf16
        a_dst = adst_ref[...]                                  # (TQ, H)  f32
        a_srt = asrct_ref[...]                                 # (H, TS)  f32
        neg_inf = jnp.asarray(NEG_INF, sm_dtype)
        slope = jnp.asarray(NEG_SLOPE, sm_dtype)
        zero = jnp.asarray(0, sm_dtype)

        for h in range(heads):                                 # heads static & small -> unrolled
            lo, hi = h * out_ch, (h + 1) * out_ch
            logits = (a_dst[:, h:h + 1].astype(sm_dtype)
                      + a_srt[h:h + 1, :].astype(sm_dtype))    # (TQ, TS) in sm_dtype
            logits = jnp.where(logits > 0, logits, slope * logits)   # LeakyReLU
            logits = jnp.where(mask, logits, neg_inf)          # mask non-edges

            m_prev = m_s[:, h:h + 1]                           # f32 running max
            blk_max = jnp.max(logits, axis=-1, keepdims=True).astype(jnp.float32)
            m_new = jnp.maximum(m_prev, blk_max)
            corr = jnp.exp(m_prev - m_new)                     # f32
            p = jnp.exp(logits - m_new.astype(sm_dtype))       # exp in sm_dtype (EUP)
            p = jnp.where(mask, p, zero)                       # load-bearing: exact zeros

            l_s[:, h:h + 1] = corr * l_s[:, h:h + 1] + jnp.sum(
                p, axis=-1, keepdims=True, dtype=jnp.float32)  # f32 reduction
            pv = jnp.dot(p.astype(hsrc.dtype), hsrc[:, lo:hi],
                         preferred_element_type=jnp.float32)   # MXU bf16 in, f32 acc
            acc_s[:, lo:hi] = corr * acc_s[:, lo:hi] + pv
            m_s[:, h:h + 1] = m_new

    @pl.when(j == pl.num_programs(1) - 1)
    def _finalize():
        l = l_s[...]
        inv_l = jnp.where(l > 0, pl.reciprocal(l, approx=True), 0.0)   # EUP reciprocal
        bias = bias_ref[...].astype(jnp.float32)               # (1, out_w), zero-padded
        if concat:
            parts = [acc_s[:, h * out_ch:(h + 1) * out_ch] * inv_l[:, h:h + 1]
                     for h in range(heads)]
            res = parts[0] if heads == 1 else jnp.concatenate(parts, axis=-1)
            width = heads * out_ch
        else:
            res = acc_s[:, 0:out_ch] * inv_l[:, 0:1]
            for h in range(1, heads):
                res = res + acc_s[:, h * out_ch:(h + 1) * out_ch] * inv_l[:, h:h + 1]
            res = res * (1.0 / heads)
            width = out_ch
        if out_w > width:                                      # lane-dense slab, single vst
            res = jnp.concatenate(
                [res, jnp.zeros((res.shape[0], out_w - width), jnp.float32)], axis=-1)
        res = res + bias
        if apply_elu:
            res = _elu(res)                                    # elu(0) = 0 keeps padding zero
        out_ref[...] = res.astype(out_ref.dtype)


# ---------------------------------------------------------------------------
# Wrappers
# ---------------------------------------------------------------------------
def _head_block_matrix(att, heads, out_ch):
    """(heads, C) attention vector -> block-diagonal (heads*C, heads) matrix."""
    eye = jnp.eye(heads, dtype=jnp.float32)
    return (att.astype(jnp.float32)[:, :, None] * eye[:, None, :]).reshape(heads * out_ch, heads)


def gat_conv_layer(x_pad, w, att_src, att_dst, adj_i8, nonempty, jmap, bias, *,
                   heads, out_ch, concat, apply_elu, sm_dtype):
    n_pad, f_in = x_pad.shape
    hc = heads * out_ch
    out_dim = hc if concat else out_ch
    out_w = max(OUT_LANES, ((out_dim + 127) // 128) * 128)

    adst_mat = _head_block_matrix(att_dst, heads, out_ch)        # (H*C, H)
    asrc_mat_t = _head_block_matrix(att_src, heads, out_ch).T    # (H, H*C)
    bias_pad = jnp.zeros((1, out_w), jnp.float32).at[:, :out_dim].set(
        bias.astype(jnp.float32))

    # ---- projection: 512-row tiles amortize the per-step pipeline overhead ----
    n_pblk = n_pad // TILE_PROJ
    hfeat, a_dst, a_src_t = pl.pallas_call(
        _proj_kernel,
        grid=(n_pblk,),
        in_specs=[
            pl.BlockSpec((TILE_PROJ, f_in), lambda i: (i, 0)),
            pl.BlockSpec((f_in, hc), lambda i: (0, 0)),          # resident
            pl.BlockSpec((hc, heads), lambda i: (0, 0)),
            pl.BlockSpec((heads, hc), lambda i: (0, 0)),
        ],
        out_specs=[
            pl.BlockSpec((TILE_PROJ, hc), lambda i: (i, 0)),
            pl.BlockSpec((TILE_PROJ, heads), lambda i: (i, 0)),
            pl.BlockSpec((heads, TILE_PROJ), lambda i: (0, i)),
        ],
        out_shape=[
            jax.ShapeDtypeStruct((n_pad, hc), jnp.bfloat16),
            jax.ShapeDtypeStruct((n_pad, heads), jnp.float32),
            jax.ShapeDtypeStruct((heads, n_pad), jnp.float32),
        ],
        compiler_params=pltpu.CompilerParams(
            dimension_semantics=("parallel",), vmem_limit_bytes=VMEM_LIMIT),
    )(x_pad, w, adst_mat, asrc_mat_t)

    # ---- attention: (dst_block, src_block) grid, dst parallel across TCs ----
    n_db = n_pad // TILE_DST
    n_sb = n_pad // TILE_SRC
    kernel = functools.partial(_attn_kernel, heads=heads, out_ch=out_ch,
                               concat=concat, apply_elu=apply_elu,
                               out_w=out_w, sm_dtype=sm_dtype)
    out = pl.pallas_call(
        kernel,
        grid_spec=pltpu.PrefetchScalarGridSpec(
            num_scalar_prefetch=2,                               # nonempty table, jmap table
            grid=(n_db, n_sb),
            in_specs=[
                pl.BlockSpec((TILE_DST, heads), lambda i, j, ne, jm: (i, 0)),
                pl.BlockSpec((heads, TILE_SRC), lambda i, j, ne, jm: (0, jm[i, j])),
                pl.BlockSpec((TILE_DST, TILE_SRC), lambda i, j, ne, jm: (i, jm[i, j])),
                pl.BlockSpec((TILE_SRC, hc), lambda i, j, ne, jm: (jm[i, j], 0)),
                pl.BlockSpec((1, out_w), lambda i, j, ne, jm: (0, 0)),
            ],
            out_specs=pl.BlockSpec((TILE_DST, out_w), lambda i, j, ne, jm: (i, 0)),
            scratch_shapes=[
                pltpu.VMEM((TILE_DST, heads), jnp.float32),   # running max
                pltpu.VMEM((TILE_DST, heads), jnp.float32),   # running denom
                pltpu.VMEM((TILE_DST, hc), jnp.float32),      # running weighted sum
            ]),
        out_shape=jax.ShapeDtypeStruct((n_pad, out_w), jnp.float32),
        compiler_params=pltpu.CompilerParams(
            dimension_semantics=("parallel", "arbitrary"),
            vmem_limit_bytes=VMEM_LIMIT),
    )(nonempty, jmap, a_dst, a_src_t, adj_i8, hfeat, bias_pad)
    return out[:, :out_dim]


def build_adjacency_int8(edge_index, num_pad):
    """Dense int8 mask adj[dst, src] = 1, with self loops (incl. pad rows so every
    softmax row has at least one unmasked entry)."""
    src, dst = edge_index[0], edge_index[1]
    adj = jnp.zeros((num_pad, num_pad), jnp.int8)
    adj = adj.at[dst, src].set(1)
    idx = jnp.arange(num_pad)
    adj = adj.at[idx, idx].set(1)
    return adj


def build_block_tables(adj_i8, tile_dst, tile_src):
    """nonempty[i,j] = block (i,j) has >=1 edge.  jmap[i,j] = j if nonempty else the
    previous nonempty j (so empty grid steps keep the same block index -> no DMA)."""
    n = adj_i8.shape[0]
    ndb, nsb = n // tile_dst, n // tile_src
    blk = adj_i8.astype(jnp.int32).reshape(ndb, tile_dst, nsb, tile_src)
    nonempty = (jnp.sum(blk, axis=(1, 3)) > 0).astype(jnp.int32)
    j_idx = jnp.arange(nsb, dtype=jnp.int32)[None, :]
    cand = jnp.where(nonempty > 0, j_idx, jnp.int32(-1))
    jmap = jnp.maximum(lax.cummax(cand, axis=1), 0).astype(jnp.int32)
    return nonempty, jmap


def gat_forward(x, edge_index, params):
    """Eval-mode forward of the two-layer GAT."""
    n, f_in = x.shape
    n_pad = ((n + TILE_SRC - 1) // TILE_SRC) * TILE_SRC       # multiple of all tiles
    x_pad = jnp.zeros((n_pad, f_in), jnp.float32).at[:n].set(x)
    adj = build_adjacency_int8(edge_index, n_pad)
    nonempty, jmap = build_block_tables(adj, TILE_DST, TILE_SRC)
    sm_dtype = _softmax_dtype()
    # dropout(p, training=False) == identity
    h = gat_conv_layer(x_pad, params["w1"], params["att_src1"], params["att_dst1"],
                       adj, nonempty, jmap, params["bias1"],
                       heads=params["heads"], out_ch=params["hidden"],
                       concat=True, apply_elu=True, sm_dtype=sm_dtype)   # GATConv1 + ELU
    out = gat_conv_layer(h, params["w2"], params["att_src2"], params["att_dst2"],
                         adj, nonempty, jmap, params["bias2"],
                         heads=1, out_ch=params["out"],
                         concat=False, apply_elu=False, sm_dtype=sm_dtype)  # GATConv2
    return out[:n]


def gat_forward_reference(x, edge_index, params):
    """Pure-JAX dense f32 reference mirroring the same math (correctness check)."""
    n = x.shape[0]
    src, dst = edge_index[0], edge_index[1]
    adj = jnp.zeros((n, n), jnp.float32).at[dst, src].set(1.0)
    adj = adj.at[jnp.arange(n), jnp.arange(n)].set(1.0)

    def layer(x, w, asrc, adst, bias, heads, out_ch, concat):
        outs = []
        for h in range(heads):
            hf = x @ w[:, h * out_ch:(h + 1) * out_ch]
            a_s = jnp.sum(hf * asrc[h][None, :], axis=-1)
            a_d = jnp.sum(hf * adst[h][None, :], axis=-1)
            logits = a_d[:, None] + a_s[None, :]
            logits = jnp.where(logits > 0, logits, NEG_SLOPE * logits)
            logits = jnp.where(adj > 0, logits, -1e30)
            attn = jax.nn.softmax(logits, axis=-1)
            outs.append(attn @ hf)
        out = jnp.concatenate(outs, -1) if concat else sum(outs) / heads
        return out + bias[0]

    h = layer(x, params["w1"], params["att_src1"], params["att_dst1"], params["bias1"],
              params["heads"], params["hidden"], True)
    h = jnp.where(h > 0, h, jnp.exp(jnp.minimum(h, 0.0)) - 1.0)
    return layer(h, params["w2"], params["att_src2"], params["att_dst2"], params["bias2"],
                 1, params["out"], False)


if __name__ == "__main__":
    # 700 nodes -> padded to 1024: dst grid 4 x src grid 2, so at least one
    # all-masked block exercises the block-skip path.  in=8, hidden=8, heads=2, out=4.
    N, IN_CH, HID, HEADS, OUT_CH = 700, 8, 8, 2, 4

    key = jax.random.PRNGKey(0)
    keys = jax.random.split(key, 8)

    x = jax.random.normal(keys[0], (N, IN_CH), jnp.float32)

    # Deterministic ring graph (both directions): edge_index[0]=src, edge_index[1]=dst
    idx = jnp.arange(N)
    src = jnp.concatenate([idx, (idx + 1) % N])
    dst = jnp.concatenate([(idx + 1) % N, idx])
    edge_index = jnp.stack([src, dst], axis=0)  # (2, 2N)

    params = {
        "heads": HEADS, "hidden": HID, "out": OUT_CH,
        # GATConv1: in -> hidden, heads=HEADS, concat=True
        "w1": 0.2 * jax.random.normal(keys[1], (IN_CH, HEADS * HID), jnp.float32),
        "att_src1": 0.2 * jax.random.normal(keys[2], (HEADS, HID), jnp.float32),
        "att_dst1": 0.2 * jax.random.normal(keys[3], (HEADS, HID), jnp.float32),
        "bias1": 0.05 * jax.random.normal(keys[4], (1, HEADS * HID), jnp.float32),
        # GATConv2: hidden*heads -> out, heads=1, concat=False
        "w2": 0.2 * jax.random.normal(keys[5], (HEADS * HID, OUT_CH), jnp.float32),
        "att_src2": 0.2 * jax.random.normal(keys[6], (1, OUT_CH), jnp.float32),
        "att_dst2": 0.2 * jax.random.normal(keys[7], (1, OUT_CH), jnp.float32),
        "bias2": jnp.zeros((1, OUT_CH), jnp.float32),
    }

    out = jax.block_until_ready(gat_forward(x, edge_index, params))
    ref = jax.block_until_ready(gat_forward_reference(x, edge_index, params))

    assert out.shape == (N, OUT_CH), out.shape
    assert jnp.all(jnp.isfinite(out))
    # Tolerance covers bf16 MXU feature path on all chips plus the bf16
    # elementwise/exp softmax path used on v6e/v7x (f32 path on v5e and older).
    assert jnp.allclose(out, ref, atol=3e-2, rtol=3e-2), float(jnp.max(jnp.abs(out - ref)))
    print("KERNEL_OK")
</pallas_src>

<mosaic_0001>
module attributes {stable_mosaic.version = 11 : i64} {
  func.func @_proj_kernel(%arg0: i32, %arg1: memref<512x8xf32, #tpu.memory_space<vmem>>, %arg2: memref<8x16xf32, #tpu.memory_space<vmem>>, %arg3: memref<16x2xf32, #tpu.memory_space<vmem>>, %arg4: memref<2x16xf32, #tpu.memory_space<vmem>>, %arg5: memref<512x16xbf16, #tpu.memory_space<vmem>>, %arg6: memref<512x2xf32, #tpu.memory_space<vmem>>, %arg7: memref<2x512xf32, #tpu.memory_space<vmem>>) attributes {dimension_semantics = [#tpu.dimension_semantics<parallel>], iteration_bounds = array<i64: 2>, scalar_prefetch = 0 : i64, scratch_operands = 0 : i64, tpu.core_type = #tpu.core_type<tc>, window_params = [{transform_indices = @transform_0, window_bounds = array<i64: 512, 8>}, {pipeline_mode = #tpu.pipeline_mode<synchronous>, transform_indices = @transform_1, window_bounds = array<i64: 8, 16>}, {pipeline_mode = #tpu.pipeline_mode<synchronous>, transform_indices = @transform_2, window_bounds = array<i64: 16, 2>}, {pipeline_mode = #tpu.pipeline_mode<synchronous>, transform_indices = @transform_3, window_bounds = array<i64: 2, 16>}, {transform_indices = @transform_4, window_bounds = array<i64: 512, 16>}, {transform_indices = @transform_5, window_bounds = array<i64: 512, 2>}, {transform_indices = @transform_6, window_bounds = array<i64: 2, 512>}]} {
    %c0 = arith.constant 0 : index
    %c0_0 = arith.constant 0 : index
    %0 = vector.load %arg1[%c0, %c0_0] : memref<512x8xf32, #tpu.memory_space<vmem>>, vector<512x8xf32>
    %1 = arith.truncf %0 : vector<512x8xf32> to vector<512x8xbf16>
    %c0_1 = arith.constant 0 : index
    %c0_2 = arith.constant 0 : index
    %2 = vector.load %arg2[%c0_1, %c0_2] : memref<8x16xf32, #tpu.memory_space<vmem>>, vector<8x16xf32>
    %3 = arith.truncf %2 : vector<8x16xf32> to vector<8x16xbf16>
    %cst = arith.constant dense<0.000000e+00> : vector<512x16xf32>
    %4 = tpu.matmul %1, %3, %cst {dimension_numbers = #tpu.dot_dimension_numbers<[1], [0], [0], [1], [0, 0, 1, 1], [], []>} : vector<512x8xbf16>, vector<8x16xbf16>, vector<512x16xf32> -> vector<512x16xf32>
    %5 = arith.truncf %4 : vector<512x16xf32> to vector<512x16xbf16>
    %c0_3 = arith.constant 0 : index
    %c0_4 = arith.constant 0 : index
    %6 = vector.load %arg5[%c0_3, %c0_4] : memref<512x16xbf16, #tpu.memory_space<vmem>>, vector<512x16xbf16>
    tpu.vector_store %arg5[%c0_3, %c0_4], %5 {strides = array<i32>} : memref<512x16xbf16, #tpu.memory_space<vmem>>, vector<512x16xbf16>,
    %c0_5 = arith.constant 0 : index
    %c0_6 = arith.constant 0 : index
    %7 = vector.load %arg3[%c0_5, %c0_6] : memref<16x2xf32, #tpu.memory_space<vmem>>, vector<16x2xf32>
    %cst_7 = arith.constant dense<0.000000e+00> : vector<512x2xf32>
    %8 = tpu.matmul %4, %7, %cst_7 {dimension_numbers = #tpu.dot_dimension_numbers<[1], [0], [0], [1], [0, 0, 1, 1], [], []>} : vector<512x16xf32>, vector<16x2xf32>, vector<512x2xf32> -> vector<512x2xf32>
    %c0_8 = arith.constant 0 : index
    %c0_9 = arith.constant 0 : index
    %9 = vector.load %arg6[%c0_8, %c0_9] : memref<512x2xf32, #tpu.memory_space<vmem>>, vector<512x2xf32>
    tpu.vector_store %arg6[%c0_8, %c0_9], %8 {strides = array<i32>} : memref<512x2xf32, #tpu.memory_space<vmem>>, vector<512x2xf32>,
    %c0_10 = arith.constant 0 : index
    %c0_11 = arith.constant 0 : index
    %10 = vector.load %arg4[%c0_10, %c0_11] : memref<2x16xf32, #tpu.memory_space<vmem>>, vector<2x16xf32>
    %cst_12 = arith.constant dense<0.000000e+00> : vector<2x512xf32>
    %11 = tpu.matmul %10, %4, %cst_12 {dimension_numbers = #tpu.dot_dimension_numbers<[1], [1], [0], [0], [0, 0, 1, 0], [], []>} : vector<2x16xf32>, vector<512x16xf32>, vector<2x512xf32> -> vector<2x512xf32>
    %c0_13 = arith.constant 0 : index
    %c0_14 = arith.constant 0 : index
    %12 = vector.load %arg7[%c0_13, %c0_14] : memref<2x512xf32, #tpu.memory_space<vmem>>, vector<2x512xf32>
    tpu.vector_store %arg7[%c0_13, %c0_14], %11 {strides = array<i32>} : memref<2x512xf32, #tpu.memory_space<vmem>>, vector<2x512xf32>,
    return
  }
  func.func @transform_0(%arg0: i32) -> (i32, i32) {
    %c0_i32 = arith.constant 0 : i32
    %c0_i32_0 = arith.constant 0 : i32
    return %arg0, %c0_i32 : i32, i32
  }
  func.func @transform_1(%arg0: i32) -> (i32, i32) {
    %c0_i32 = arith.constant 0 : i32
    %c0_i32_0 = arith.constant 0 : i32
    %c0_i32_1 = arith.constant 0 : i32
    return %c0_i32, %c0_i32_0 : i32, i32
  }
  func.func @transform_2(%arg0: i32) -> (i32, i32) {
    %c0_i32 = arith.constant 0 : i32
    %c0_i32_0 = arith.constant 0 : i32
    %c0_i32_1 = arith.constant 0 : i32
    return %c0_i32, %c0_i32_0 : i32, i32
  }
  func.func @transform_3(%arg0: i32) -> (i32, i32) {
    %c0_i32 = arith.constant 0 : i32
    %c0_i32_0 = arith.constant 0 : i32
    %c0_i32_1 = arith.constant 0 : i32
    return %c0_i32, %c0_i32_0 : i32, i32
  }
  func.func @transform_4(%arg0: i32) -> (i32, i32) {
    %c0_i32 = arith.constant 0 : i32
    %c0_i32_0 = arith.constant 0 : i32
    return %arg0, %c0_i32 : i32, i32
  }
  func.func @transform_5(%arg0: i32) -> (i32, i32) {
    %c0_i32 = arith.constant 0 : i32
    %c0_i32_0 = arith.constant 0 : i32
    return %arg0, %c0_i32 : i32, i32
  }
  func.func @transform_6(%arg0: i32) -> (i32, i32) {
    %c0_i32 = arith.constant 0 : i32
    %c0_i32_0 = arith.constant 0 : i32
    return %c0_i32, %arg0 : i32, i32
  }
}

</mosaic_0001>

<bundles_post_ra>
// kernel: tpu_custom_call.1
= control target key start
LH: loop header
LB: loop body
LE: loop exit
PB: predicated region body
PF: predicated region fallthrough
CT: control target
= control target key end

     0   :  { %12 = vsyncpa [#allocation3], 0  ;;  %s3816_s0 = inlined_call_operand.vmem [shape: f32[1024,8], index: 0, kind: input, shape index: {}]   ;;  %s3817_s1 = inlined_call_operand.vmem [shape: f32[8,16], index: 1, kind: input, shape index: {}]   ;;  %s3818_s2 = inlined_call_operand.vmem [shape: f32[16,2], index: 2, kind: input, shape index: {}]   ;;  %s3819_s3 = inlined_call_operand.vmem [shape: f32[2,16], index: 3, kind: input, shape index: {}]   ;;  %s3820_s4 = inlined_call_operand.vmem [shape: bf16[1024,16], index: 4, kind: output, shape index: {0}]   ;;  %s3821_s5 = inlined_call_operand.vmem [shape: f32[1024,2], index: 5, kind: output, shape index: {1}]   ;;  %s3822_s6 = inlined_call_operand.hbm [shape: f32[2,1024], index: 6, kind: output, shape index: {2}]  }
   0x1   :  { %14 = vsyncpa [#allocation3 + $0x1], 0  ;;  %s2928_s21 = smov 0   ;;  %s2930_s22 = smov 0  }
   0x2   :  { %s2932_s23 = smov 0   ;;  %s2934_s24 = smov 0  }
   0x3 LB: > { %s2949_s25 = sadd.s32 4294967295, %s2889_s24   ;;  %s2046_s26 = sadd.s32 4294967294, %s2889_s24   ;;  %s2889_s24 = sphi %s2934_s24, %s3830_s24   ;;  %s2885_s23 = sphi %s2932_s23, %s3829_s23   ;;  %s2881_s22 = sphi %s2930_s22, %s3828_s22   ;;  %s2877_s21 = sphi %s2928_s21, %s3827_s21  }
   0x4   : > { %s2953_s27 = sadd.s32 1, %s2889_s24   ;;  %s168_s28 = sadd.s32 1, %s2885_s23 }
   0x5   : > { %s165_s29 = ssub.s32 %s2889_s24, %s2953_s27  ;;  %p178_p0 = scmp.ne.s32.totalorder %s2885_s23, %s2881_s22 }
   0x6   : > { %p166_p1 = scmp.eq.s32.totalorder %s165_s29, 0  ;;  %p179_p2 = scmp.eq.s32.totalorder %s2949_s25, 1 }
   0x7   : > { %p184_p3 = scmp.ne.s32.totalorder %s2881_s22, %s2877_s21  ;;  %p185_p4 = scmp.eq.s32.totalorder %s2046_s26, 1 }
   0x8   : > { %s2964_s30 = scalar_select %p166_p1, %s2885_s23, %s168_s28  }
   0x9   : > { %p2966_p5 = por %p179_p2, %p178_p0  ;;  %p2970_p6 = por %p185_p4, %p184_p3 }
   0xa   : > { %p2049_p7 = scmp.ge.s32.totalorder %s2889_s24, 1  ;;  %p221_p8 = scmp.lt.s32.totalorder %s2889_s24, 3 }
   0xc   : > { %p222_p9 = pnand %p2049_p7, %p221_p8 }
   0xd   : > { %v377_v0 = vld [vmem:[%s3817_s1] sm:$0xff] (!%p222_p9)  ;;  %vm476_vm0 = vcmask (!%p222_p9), 1043456   ;;  %s2051_s11 = sshll.u32 (!%p222_p9), %s2949_s25, 6  ;;  %vm379_vm1 = vcmask (!%p222_p9), 64512   ;;  %vm1092_vm2 = vcmask (!%p222_p9), 130048   ;;  %vm1025_vm3 = vcmask (!%p222_p9), 125952  }
   0xe   : > { %225 = sbr.rel (%p222_p9) target bundleno = 638 (0x27e), region = 36  ;;  %v378_v1 = vpack.c.bf16 (!%p222_p9), %v377_v0, %v377_v0  ;;  %p262_p10 = scmp.lt.s32.totalorder (!%p222_p9), %s2051_s11, 127  ;;  %vm3247_vm4 = vmpackc.low (!%p222_p9), %vm1092_vm2, %vm1092_vm2  ;;  %vm1670_vm5 = vcmask (!%p222_p9), 15360  }
   0xf   : > { %s2352_s16 = sshll.u32 (!%p222_p9), %s2949_s25, 7  ;;  %s2892_s25 = smov (!%p222_p9), [#allocation2]  }
  0x10   : > { %2786 = vmatprep.subr.msk.bf16.mxu0 (!%p222_p9), %vm476_vm0, %v378_v1  ;;  %v478_v2 = vsel (!%p222_p9), %vm476_vm0, %v378_v1, 0  ;;  %s3774_s26 = scalar_lea.hbm (!%p222_p9), %s3822_s6, %s2352_s16  ;;  %s2831_s9 = sshll.u32 (!%p222_p9), %s2892_s25, 4  ;;  %s2832_s9 = int_to_ptr.vmem [resolvable:$false] %s2831_s9 }
  0x11   : > { %2521 = vmatpush3.bf16.msra.mxu0 (!%p222_p9), %v478_v2  ;;  %s2833_s10 = scalar_lea.vmem (!%p222_p9), %s2832_s9, 256 }
  0x15   : > { %s3832_s11 = smov (!%p262_p10, %s2051_s11), 127 }
  0x16   : > { %s2052_s12 = sshll.u32 %s3832_s11, 3  ;;  %s2054_s20 = sshll.u32 %s3832_s11, 2 }
  0x17   : > { %s2988_s15 = scalar_lea.vmem %s3816_s0, %s2052_s12  ;;  %s3096_s29 = scalar_lea.vmem %s3820_s4, %s2054_s20 }
  0x18   : > { %v281_v3 = vld [vmem:[%s2988_s15] sm:$0xff]  ;;  %v282_v4 = vld [vmem:[%s2988_s15 + $0x8] sm:$0xff]  ;;  %v283_v5 = vld [vmem:[%s2988_s15 + $0x10] sm:$0xff]  ;;  %s258_s11 = sand.u32 1, %s2881_s22  }
  0x19   : > { %v345_v6 = vpack.c.bf16 %v282_v4, %v281_v3  ;;  %v284_v7 = vld [vmem:[%s2988_s15 + $0x18] sm:$0xff]  ;;  %v285_v8 = vld [vmem:[%s2988_s15 + $0x20] sm:$0xff]  ;;  %v286_v9 = vld [vmem:[%s2988_s15 + $0x28] sm:$0xff]  ;;  %s1915_s28 = scalar_lea.sflag [#allocation3], %s258_s11 }
  0x1a   : > { %v346_v10 = vpack.c.bf16 %v284_v7, %v283_v5  ;;  %v347_v11 = vpack.c.bf16 %v286_v9, %v285_v8  ;;  %v287_v12 = vld [vmem:[%s2988_s15 + $0x30] sm:$0xff]  ;;  %v288_v13 = vld [vmem:[%s2988_s15 + $0x38] sm:$0xff]  ;;  %v289_v14 = vld [vmem:[%s2988_s15 + $0x40] sm:$0xff] }
  0x1b   : > { %2522 = vmatprep.mubr.msk.bf16.mxu0 %vm379_vm1, %v345_v6  ;;  %v290_v15 = vld [vmem:[%s2988_s15 + $0x48] sm:$0xff]  ;;  %v348_v16 = vpack.c.bf16 %v288_v13, %v287_v12  ;;  %v291_v18 = vld [vmem:[%s2988_s15 + $0x50] sm:$0xff]  ;;  %v292_v19 = vld [vmem:[%s2988_s15 + $0x58] sm:$0xff] }
  0x1c   : > { %2523 = vmatmul.mubr.msk.bf16.vlgmr.msra.gmra.mrb[0].mxu0 %vm379_vm1, %v346_v10  ;;  %v349_v17 = vpack.c.bf16 %v290_v15, %v289_v14  ;;  %v293_v20 = vld [vmem:[%s2988_s15 + $0x60] sm:$0xff]  ;;  %v294_v21 = vld [vmem:[%s2988_s15 + $0x68] sm:$0xff]  ;;  %v350_v22 = vpack.c.bf16 %v292_v19, %v291_v18  ;;  %v295_v24 = vld [vmem:[%s2988_s15 + $0x70] sm:$0xff] }
  0x1d   : > { %2526 = vmatprep.mubr.msk.bf16.mxu0 %vm379_vm1, %v347_v11  ;;  %v351_v23 = vpack.c.bf16 %v294_v21, %v293_v20  ;;  %v296_v25 = vld [vmem:[%s2988_s15 + $0x78] sm:$0xff]  ;;  %v297_v26 = vld [vmem:[%s2988_s15 + $0x80] sm:$0xff]  ;;  %v298_v27 = vld [vmem:[%s2988_s15 + $0x88] sm:$0xff] }
  0x1e   : > { %v352_v28 = vpack.c.bf16 %v296_v25, %v295_v24  ;;  %v353_v29 = vpack.c.bf16 %v298_v27, %v297_v26  ;;  %v299_v30 = vld [vmem:[%s2988_s15 + $0x90] sm:$0xff]  ;;  %v300_v31 = vld [vmem:[%s2988_s15 + $0x98] sm:$0xff]  ;;  %v301_v32 = vld [vmem:[%s2988_s15 + $0xa0] sm:$0xff] }
  0x1f   : > { %v302_v33 = vld [vmem:[%s2988_s15 + $0xa8] sm:$0xff]  ;;  %v354_v34 = vpack.c.bf16 %v300_v31, %v299_v30  ;;  %v303_v36 = vld [vmem:[%s2988_s15 + $0xb0] sm:$0xff]  ;;  %v304_v37 = vld [vmem:[%s2988_s15 + $0xb8] sm:$0xff] }
  0x20   : > { %v355_v35 = vpack.c.bf16 %v302_v33, %v301_v32  ;;  %v305_v38 = vld [vmem:[%s2988_s15 + $0xc0] sm:$0xff]  ;;  %v306_v39 = vld [vmem:[%s2988_s15 + $0xc8] sm:$0xff]  ;;  %v356_v40 = vpack.c.bf16 %v304_v37, %v303_v36  ;;  %v307_v42 = vld [vmem:[%s2988_s15 + $0xd0] sm:$0xff] }
  0x21   : > { %v357_v41 = vpack.c.bf16 %v306_v39, %v305_v38  ;;  %v308_v43 = vld [vmem:[%s2988_s15 + $0xd8] sm:$0xff]  ;;  %v309_v44 = vld [vmem:[%s2988_s15 + $0xe0] sm:$0xff]  ;;  %v310_v45 = vld [vmem:[%s2988_s15 + $0xe8] sm:$0xff] }
  0x22   : > { %v358_v46 = vpack.c.bf16 %v308_v43, %v307_v42  ;;  %v359_v47 = vpack.c.bf16 %v310_v45, %v309_v44  ;;  %v311_v48 = vld [vmem:[%s2988_s15 + $0xf0] sm:$0xff]  ;;  %v312_v49 = vld [vmem:[%s2988_s15 + $0xf8] sm:$0xff]  ;;  %v313_v50 = vld [vmem:[%s2988_s15 + $0x100] sm:$0xff] }
  0x23   : > { %v314_v51 = vld [vmem:[%s2988_s15 + $0x108] sm:$0xff]  ;;  %v360_v52 = vpack.c.bf16 %v312_v49, %v311_v48  ;;  %v315_v54 = vld [vmem:[%s2988_s15 + $0x110] sm:$0xff]  ;;  %v316_v55 = vld [vmem:[%s2988_s15 + $0x118] sm:$0xff] }
  0x24   : > { %2527 = vmatmul.mubr.msk.bf16.gmra.mrb[4].mxu0 %vm379_vm1, %v348_v16  ;;  %v361_v53 = vpack.c.bf16 %v314_v51, %v313_v50  ;;  %v317_v56 = vld [vmem:[%s2988_s15 + $0x120] sm:$0xff]  ;;  %v318_v57 = vld [vmem:[%s2988_s15 + $0x128] sm:$0xff]  ;;  %v362_v58 = vpack.c.bf16 %v316_v55, %v315_v54  ;;  %v319_v60 = vld [vmem:[%s2988_s15 + $0x130] sm:$0xff] }
  0x25   : > { %2530 = vmatprep.mubr.msk.bf16.mxu0 %vm379_vm1, %v349_v17  ;;  %v363_v59 = vpack.c.bf16 %v318_v57, %v317_v56  ;;  %v320_v61 = vld [vmem:[%s2988_s15 + $0x138] sm:$0xff]  ;;  %v321_v62 = vld [vmem:[%s2988_s15 + $0x140] sm:$0xff]  ;;  %v322_v63 = vld [vmem:[%s2988_s15 + $0x148] sm:$0xff] }
  0x26   : > { %v364_v0 = vpack.c.bf16 %v320_v61, %v319_v60  ;;  %v365_v1 = vpack.c.bf16 %v322_v63, %v321_v62  ;;  %v323_v2 = vld [vmem:[%s2988_s15 + $0x150] sm:$0xff]  ;;  %v324_v3 = vld [vmem:[%s2988_s15 + $0x158] sm:$0xff]  ;;  %v325_v4 = vld [vmem:[%s2988_s15 + $0x160] sm:$0xff] }
  0x27   : > { %v326_v5 = vld [vmem:[%s2988_s15 + $0x168] sm:$0xff]  ;;  %v366_v6 = vpack.c.bf16 %v324_v3, %v323_v2  ;;  %v1090_v8 = vld [vmem:[%s3818_s2] sm:$0xff]  ;;  %v327_v10 = vld [vmem:[%s2988_s15 + $0x170] sm:$0xff] }
  0x28   : > { %v367_v7 = vpack.c.bf16 %v326_v5, %v325_v4  ;;  %v1091_v9 = vld [vmem:[%s3818_s2 + $0x8] sm:$0xff]  ;;  %v328_v11 = vld [vmem:[%s2988_s15 + $0x178] sm:$0xff]  ;;  %v329_v13 = vld [vmem:[%s2988_s15 + $0x180] sm:$0xff] }
  0x29   : > { %v2686_v12 = vpack.c.bf16 %v1091_v9, %v1090_v8  ;;  %v330_v14 = vld [vmem:[%s2988_s15 + $0x188] sm:$0xff]  ;;  %v368_v15 = vpack.c.bf16 %v328_v11, %v327_v10  ;;  %v331_v17 = vld [vmem:[%s2988_s15 + $0x190] sm:$0xff]  ;;  %v332_v18 = vld [vmem:[%s2988_s15 + $0x198] sm:$0xff] }
  0x2a   : > { %v369_v16 = vpack.c.bf16 %v330_v14, %v329_v13  ;;  %v333_v19 = vld [vmem:[%s2988_s15 + $0x1a0] sm:$0xff]  ;;  %v334_v20 = vld [vmem:[%s2988_s15 + $0x1a8] sm:$0xff]  ;;  %v370_v21 = vpack.c.bf16 %v332_v18, %v331_v17  ;;  %v336_v24 = vld [vmem:[%s2988_s15 + $0x1b8] sm:$0xff] }
  0x2b   : > { %2687 = vmatprep.subr.bf16.mxu1 %v2686_v12  ;;  %v337_v25 = vld [vmem:[%s2988_s15 + $0x1c0] sm:$0xff]  ;;  %v338_v26 = vld [vmem:[%s2988_s15 + $0x1c8] sm:$0xff]  ;;  %v340_v30 = vld [vmem:[%s2988_s15 + $0x1d8] sm:$0xff] }
  0x2c   : > { %2531 = vmatmul.mubr.msk.bf16.gmra.mrb[8].mxu0 %vm379_vm1, %v350_v22  ;;  %2689 = vmatpush3.bf16.msra.mxu1 %v2686_v12  ;;  %v371_v22 = vpack.c.bf16 %v334_v20, %v333_v19  ;;  %v341_v31 = vld [vmem:[%s2988_s15 + $0x1e0] sm:$0xff]  ;;  %v342_v32 = vld [vmem:[%s2988_s15 + $0x1e8] sm:$0xff]  ;;  %v344_v36 = vld [vmem:[%s2988_s15 + $0x1f8] sm:$0xff] }
  0x2d   : > { %2534 = vmatprep.mubr.msk.bf16.mxu0 %vm379_vm1, %v351_v23  ;;  %v335_v23 = vld [vmem:[%s2988_s15 + $0x1b0] sm:$0xff] }
  0x2e   : > { %v372_v27 = vpack.c.bf16 %v336_v24, %v335_v23  ;;  %v3254_v23 = vld [vmem:[%s3819_s3] sm:$0x3] }
  0x34   : > { %2535 = vmatmul.mubr.msk.bf16.gmra.mrb[12].mxu0 %vm379_vm1, %v352_v28  ;;  %v373_v28 = vpack.c.bf16 %v338_v26, %v337_v25 }
  0x35   : > { %2538 = vmatprep.mubr.msk.bf16.mxu0 %vm379_vm1, %v353_v29  ;;  %v339_v29 = vld [vmem:[%s2988_s15 + $0x1d0] sm:$0xff] }
  0x36   : > { %v374_v33 = vpack.c.bf16 %v340_v30, %v339_v29 }
  0x3c   : > { %2539 = vmatmul.mubr.msk.bf16.gmra.mrb[16].mxu0 %vm379_vm1, %v354_v34  ;;  %v375_v34 = vpack.c.bf16 %v342_v32, %v341_v31 }
  0x3d   : > { %2542 = vmatprep.mubr.msk.bf16.mxu0 %vm379_vm1, %v355_v35  ;;  %v343_v35 = vld [vmem:[%s2988_s15 + $0x1f0] sm:$0xff]  ;;  %s3639_s15 = scalar_lea.vmem %s3821_s5, %s2052_s12  ;;  %s2050_s12 = sshll.u32 %s258_s11, 3 }
  0x3e   : > { %v376_v37 = vpack.c.bf16 %v344_v36, %v343_v35  ;;  %s260_s17 = scalar_lea.vmem [#allocation2], %s2050_s12 }
  0x3f   : > { %s1937_s18 = sshll.u32 %s260_s17, 4  ;;  %s3776_s18 = int_to_ptr.vmem [resolvable:$true] %s1937_s18 }
  0x40   : > { %p2834_p0 = scmp.lt.s32.totalorder %s3776_s18, %s2832_s9 }
  0x44   : > { %2543 = vmatmul.mubr.msk.bf16.gmra.mrb[20].mxu0 %vm379_vm1, %v356_v40 }
  0x45   : > { %2546 = vmatprep.mubr.msk.bf16.mxu0 %vm379_vm1, %v357_v41 }
  0x4c   : > { %2547 = vmatmul.mubr.msk.bf16.gmra.mrb[24].mxu0 %vm379_vm1, %v358_v46 }
  0x4d   : > { %2550 = vmatprep.mubr.msk.bf16.mxu0 %vm379_vm1, %v359_v47 }
  0x54   : > { %2551 = vmatmul.mubr.msk.bf16.gmra.mrb[28].mxu0 %vm379_vm1, %v360_v52 }
  0x55   : > { %2554 = vmatprep.mubr.msk.bf16.mxu0 %vm379_vm1, %v361_v53 }
  0x5c   : > { %2555 = vmatmul.mubr.msk.bf16.gmra.mrb[32].mxu0 %vm379_vm1, %v362_v58 }
  0x5d   : > { %2558 = vmatprep.mubr.msk.bf16.mxu0 %vm379_vm1, %v363_v59 }
  0x64   : > { %2559 = vmatmul.mubr.msk.bf16.gmra.mrb[36].mxu0 %vm379_vm1, %v364_v0 }
  0x65   : > { %2562 = vmatprep.mubr.msk.bf16.mxu0 %vm379_vm1, %v365_v1 }
  0x6c   : > { %2563 = vmatmul.mubr.msk.bf16.gmra.mrb[40].mxu0 %vm379_vm1, %v366_v6 }
  0x6d   : > { %2566 = vmatprep.mubr.msk.bf16.mxu0 %vm379_vm1, %v367_v7 }
  0x74   : > { %2567 = vmatmul.mubr.msk.bf16.gmra.mrb[44].mxu0 %vm379_vm1, %v368_v15 }
  0x75   : > { %2570 = vmatprep.mubr.msk.bf16.mxu0 %vm379_vm1, %v369_v16 }
  0x7c   : > { %2571 = vmatmul.mubr.msk.bf16.gmra.mrb[48].mxu0 %vm379_vm1, %v370_v21 }
  0x7d   : > { %2574 = vmatprep.mubr.msk.bf16.mxu0 %vm379_vm1, %v371_v22 }
  0x84   : > { %2575 = vmatmul.mubr.msk.bf16.gmra.mrb[52].mxu0 %vm379_vm1, %v372_v27 }
  0x85   : > { %2578 = vmatprep.mubr.msk.bf16.mxu0 %vm379_vm1, %v373_v28 }
  0x8c   : > { %2579 = vmatmul.mubr.msk.bf16.gmra.mrb[56].mxu0 %vm379_vm1, %v374_v33 }
  0x8d   : > { %2582 = vmatprep.mubr.msk.bf16.mxu0 %vm379_vm1, %v375_v34 }
  0x94   : > { %2583 = vmatmul.mubr.msk.bf16.gmra.mrb[60].mxu0 %vm379_vm1, %v376_v37 }
  0x95   : > { %2484 = vmatprep.mubr.msk.f32.mxu0 %vm1092_vm2, %v3254_v23 }
  0xef   : > { %v3098_v38 = vpop.f32.mrb[0].mxu0 }
  0xf0   : > { %v2290_v39 = vpack.c.bf16 %v3098_v38, %v3098_v38  ;;  %v3102_v40 = vpop.f32.mrb[1].mxu0 }
  0xf1   : > { %v2288_v41 = vpack.c.bf16 %v3102_v40, %v3102_v40  ;;  %v3106_v42 = vpop.f32.mrb[2].mxu0  ;;  %2590 = vmatprep.mubr.msk.f32.mxu1 %vm1092_vm2, %v3102_v40 }
  0xf2   : > { %1028 = vst.msk [vmem:[%s3096_s29 + $0x8] sm:$0xf] %vm1025_vm3, %v2290_v39  ;;  %v2291_v43 = vpack.c.bf16 %v3106_v42, %v3106_v42  ;;  %v2699_v44 = vpack.c.bf16 %v3106_v42, %v3098_v38  ;;  %v3116_v45 = vpop.f32.mrb[3].mxu0 }
  0xf3   : > { %1026 = vst.msk [vmem:[%s3096_s29] sm:$0xf] %vm1025_vm3, %v2288_v41  ;;  %v2289_v46 = vpack.c.bf16 %v3116_v45, %v3116_v45  ;;  %v2693_v47 = vpack.c.bf16 %v3116_v45, %v3102_v40  ;;  %2591 = vmatmul.mubr.msk.f32.vlgmr.msra.gmra.mrb[0].mxu1 %vm1092_vm2, %v3116_v45 }
  0xf4   : > { %1029 = vst.msk [vmem:[%s3096_s29 + $0xc] sm:$0xf] %vm1025_vm3, %v2291_v43  ;;  %2593 = vmatprep.mubr.msk.f32.mxu1 %vm1092_vm2, %v3098_v38 }
  0xf5   : > { %1027 = vst.msk [vmem:[%s3096_s29 + $0x4] sm:$0xf] %vm1025_vm3, %v2289_v46 }
  0xf7   : > { %v3132_v48 = vpop.f32.mrb[4].mxu0  ;;  %2594 = vmatmul.mubr.msk.f32.gmra.mrb[2].mxu1 %vm1092_vm2, %v3106_v42 }
  0xf8   : > { %v2294_v49 = vpack.c.bf16 %v3132_v48, %v3132_v48  ;;  %v3138_v50 = vpop.f32.mrb[5].mxu0 }
  0xf9   : > { %v2292_v51 = vpack.c.bf16 %v3138_v50, %v3138_v50  ;;  %v3142_v52 = vpop.f32.mrb[6].mxu0  ;;  %2596 = vmatprep.mubr.msk.f32.mxu1 %vm1092_vm2, %v3138_v50 }
  0xfa   : > { %1032 = vst.msk [vmem:[%s3096_s29 + $0x18] sm:$0xf] %vm1025_vm3, %v2294_v49  ;;  %v2295_v53 = vpack.c.bf16 %v3142_v52, %v3142_v52  ;;  %v2711_v54 = vpack.c.bf16 %v3142_v52, %v3132_v48  ;;  %v3152_v55 = vpop.f32.mrb[7].mxu0 }
  0xfb   : > { %1030 = vst.msk [vmem:[%s3096_s29 + $0x10] sm:$0xf] %vm1025_vm3, %v2292_v51  ;;  %v2293_v56 = vpack.c.bf16 %v3152_v55, %v3152_v55  ;;  %v2705_v57 = vpack.c.bf16 %v3152_v55, %v3138_v50  ;;  %2597 = vmatmul.mubr.msk.f32.gmra.mrb[4].mxu1 %vm1092_vm2, %v3152_v55 }
  0xfc   : > { %1033 = vst.msk [vmem:[%s3096_s29 + $0x1c] sm:$0xf] %vm1025_vm3, %v2295_v53  ;;  %2599 = vmatprep.mubr.msk.f32.mxu1 %vm1092_vm2, %v3132_v48 }
  0xfd   : > { %1031 = vst.msk [vmem:[%s3096_s29 + $0x14] sm:$0xf] %vm1025_vm3, %v2293_v56 }
  0xff   : > { %v3168_v58 = vpop.f32.mrb[8].mxu0  ;;  %2600 = vmatmul.mubr.msk.f32.gmra.mrb[6].mxu1 %vm1092_vm2, %v3142_v52 }
 0x100   : > { %v2298_v59 = vpack.c.bf16 %v3168_v58, %v3168_v58  ;;  %v3174_v60 = vpop.f32.mrb[9].mxu0 }
 0x101   : > { %v2296_v61 = vpack.c.bf16 %v3174_v60, %v3174_v60  ;;  %v3178_v62 = vpop.f32.mrb[10].mxu0  ;;  %2602 = vmatprep.mubr.msk.f32.mxu1 %vm1092_vm2, %v3174_v60 }
 0x102   : > { %1036 = vst.msk [vmem:[%s3096_s29 + $0x28] sm:$0xf] %vm1025_vm3, %v2298_v59  ;;  %v2299_v63 = vpack.c.bf16 %v3178_v62, %v3178_v62  ;;  %v2723_v0 = vpack.c.bf16 %v3178_v62, %v3168_v58  ;;  %v3188_v1 = vpop.f32.mrb[11].mxu0 }
 0x103   : > { %1034 = vst.msk [vmem:[%s3096_s29 + $0x20] sm:$0xf] %vm1025_vm3, %v2296_v61  ;;  %v2297_v2 = vpack.c.bf16 %v3188_v1, %v3188_v1  ;;  %v2717_v3 = vpack.c.bf16 %v3188_v1, %v3174_v60  ;;  %2603 = vmatmul.mubr.msk.f32.gmra.mrb[8].mxu1 %vm1092_vm2, %v3188_v1 }
 0x104   : > { %1037 = vst.msk [vmem:[%s3096_s29 + $0x2c] sm:$0xf] %vm1025_vm3, %v2299_v63  ;;  %2605 = vmatprep.mubr.msk.f32.mxu1 %vm1092_vm2, %v3168_v58 }
 0x105   : > { %1035 = vst.msk [vmem:[%s3096_s29 + $0x24] sm:$0xf] %vm1025_vm3, %v2297_v2 }
 0x107   : > { %v3204_v4 = vpop.f32.mrb[12].mxu0  ;;  %2606 = vmatmul.mubr.msk.f32.gmra.mrb[10].mxu1 %vm1092_vm2, %v3178_v62 }
 0x108   : > { %v2302_v5 = vpack.c.bf16 %v3204_v4, %v3204_v4  ;;  %v3210_v6 = vpop.f32.mrb[13].mxu0 }
 0x109   : > { %v2300_v7 = vpack.c.bf16 %v3210_v6, %v3210_v6  ;;  %v3214_v8 = vpop.f32.mrb[14].mxu0  ;;  %2608 = vmatprep.mubr.msk.f32.mxu1 %vm1092_vm2, %v3210_v6 }
 0x10a   : > { %1040 = vst.msk [vmem:[%s3096_s29 + $0x38] sm:$0xf] %vm1025_vm3, %v2302_v5  ;;  %v2303_v9 = vpack.c.bf16 %v3214_v8, %v3214_v8  ;;  %v2735_v10 = vpack.c.bf16 %v3214_v8, %v3204_v4  ;;  %v3224_v11 = vpop.f32.mrb[15].mxu0 }
 0x10b   : > { %1038 = vst.msk [vmem:[%s3096_s29 + $0x30] sm:$0xf] %vm1025_vm3, %v2300_v7  ;;  %v2301_v12 = vpack.c.bf16 %v3224_v11, %v3224_v11  ;;  %v2729_v13 = vpack.c.bf16 %v3224_v11, %v3210_v6  ;;  %2609 = vmatmul.mubr.msk.f32.gmra.mrb[12].mxu1 %vm1092_vm2, %v3224_v11 }
 0x10c   : > { %1041 = vst.msk [vmem:[%s3096_s29 + $0x3c] sm:$0xf] %vm1025_vm3, %v2303_v9  ;;  %2611 = vmatprep.mubr.msk.f32.mxu1 %vm1092_vm2, %v3204_v4 }
 0x10d   : > { %1039 = vst.msk [vmem:[%s3096_s29 + $0x34] sm:$0xf] %vm1025_vm3, %v2301_v12 }
 0x10f   : > { %v2540_v14 = vpop.f32.mrb[16].mxu0  ;;  %2612 = vmatmul.mubr.msk.f32.gmra.mrb[14].mxu1 %vm1092_vm2, %v3214_v8 }
 0x110   : > { %v2306_v15 = vpack.c.bf16 %v2540_v14, %v2540_v14  ;;  %v578_v16 = vpop.f32.mrb[17].mxu0 }
 0x111   : > { %v2304_v17 = vpack.c.bf16 %v578_v16, %v578_v16  ;;  %v2541_v18 = vpop.f32.mrb[18].mxu0  ;;  %2614 = vmatprep.mubr.msk.f32.mxu1 %vm1092_vm2, %v578_v16 }
 0x112   : > { %1044 = vst.msk [vmem:[%s3096_s29 + $0x48] sm:$0xf] %vm1025_vm3, %v2306_v15  ;;  %v2307_v19 = vpack.c.bf16 %v2541_v18, %v2541_v18  ;;  %v2696_v20 = vpack.c.bf16 %v2541_v18, %v2540_v14  ;;  %v581_v21 = vpop.f32.mrb[19].mxu0 }
 0x113   : > { %1042 = vst.msk [vmem:[%s3096_s29 + $0x40] sm:$0xf] %vm1025_vm3, %v2304_v17  ;;  %v2305_v24 = vpack.c.bf16 %v581_v21, %v581_v21  ;;  %v2690_v25 = vpack.c.bf16 %v581_v21, %v578_v16  ;;  %2615 = vmatmul.mubr.msk.f32.gmra.mrb[16].mxu1 %vm1092_vm2, %v581_v21 }
 0x114   : > { %1045 = vst.msk [vmem:[%s3096_s29 + $0x4c] sm:$0xf] %vm1025_vm3, %v2307_v19  ;;  %2617 = vmatprep.mubr.msk.f32.mxu1 %vm1092_vm2, %v2540_v14 }
 0x115   : > { %1043 = vst.msk [vmem:[%s3096_s29 + $0x44] sm:$0xf] %vm1025_vm3, %v2305_v24  ;;  %2692 = vmatprep.subr.msk.bf16.mxu0 %vm3247_vm4, %v2690_v25 }
 0x116   : > { %2695 = vmatpush3.bf16.xpose.msk.msra.mxu0 %vm3247_vm4, %v2693_v47 }
 0x117   : > { %v2544_v26 = vpop.f32.mrb[20].mxu0  ;;  %2618 = vmatmul.mubr.msk.f32.gmra.mrb[18].mxu1 %vm1092_vm2, %v2541_v18  ;;  %2698 = vmatprep.subr.msk.bf16.mxu0 %vm3247_vm4, %v2696_v20 }
 0x118   : > { %v2310_v27 = vpack.c.bf16 %v2544_v26, %v2544_v26  ;;  %v594_v28 = vpop.f32.mrb[21].mxu0 }
 0x119   : > { %v2308_v29 = vpack.c.bf16 %v594_v28, %v594_v28  ;;  %v2545_v30 = vpop.f32.mrb[22].mxu0  ;;  %2620 = vmatprep.mubr.msk.f32.mxu1 %vm1092_vm2, %v594_v28 }
 0x11a   : > { %1048 = vst.msk [vmem:[%s3096_s29 + $0x58] sm:$0xf] %vm1025_vm3, %v2310_v27  ;;  %v2311_v31 = vpack.c.bf16 %v2545_v30, %v2545_v30  ;;  %v2708_v32 = vpack.c.bf16 %v2545_v30, %v2544_v26  ;;  %v597_v33 = vpop.f32.mrb[23].mxu0 }
 0x11b   : > { %1046 = vst.msk [vmem:[%s3096_s29 + $0x50] sm:$0xf] %vm1025_vm3, %v2308_v29  ;;  %v2309_v34 = vpack.c.bf16 %v597_v33, %v597_v33  ;;  %v2702_v35 = vpack.c.bf16 %v597_v33, %v594_v28  ;;  %2621 = vmatmul.mubr.msk.f32.gmra.mrb[20].mxu1 %vm1092_vm2, %v597_v33 }
 0x11c   : > { %1049 = vst.msk [vmem:[%s3096_s29 + $0x5c] sm:$0xf] %vm1025_vm3, %v2311_v31  ;;  %2623 = vmatprep.mubr.msk.f32.mxu1 %vm1092_vm2, %v2544_v26 }
 0x11d   : > { %1047 = vst.msk [vmem:[%s3096_s29 + $0x54] sm:$0xf] %vm1025_vm3, %v2309_v34 }
 0x11e   : > { %2701 = vmatpush3.bf16.xpose.msk.msra.mxu0 %vm3247_vm4, %v2699_v44 }
 0x11f   : > { %v3292_v36 = vpop.f32.mrb[24].mxu0  ;;  %2624 = vmatmul.mubr.msk.f32.gmra.mrb[22].mxu1 %vm1092_vm2, %v2545_v30  ;;  %2704 = vmatprep.subr.msk.bf16.mxu0 %vm3247_vm4, %v2702_v35 }
 0x120   : > { %v2314_v37 = vpack.c.bf16 %v3292_v36, %v3292_v36  ;;  %v610_v39 = vpop.f32.mrb[25].mxu0 }
 0x121   : > { %v2312_v40 = vpack.c.bf16 %v610_v39, %v610_v39  ;;  %v2549_v41 = vpop.f32.mrb[26].mxu0  ;;  %2626 = vmatprep.mubr.msk.f32.mxu1 %vm1092_vm2, %v610_v39 }
 0x122   : > { %1052 = vst.msk [vmem:[%s3096_s29 + $0x68] sm:$0xf] %vm1025_vm3, %v2314_v37  ;;  %v2315_v38 = vpack.c.bf16 %v2549_v41, %v2549_v41  ;;  %v2720_v42 = vpack.c.bf16 %v2549_v41, %v3292_v36  ;;  %v613_v43 = vpop.f32.mrb[27].mxu0 }
 0x123   : > { %1050 = vst.msk [vmem:[%s3096_s29 + $0x60] sm:$0xf] %vm1025_vm3, %v2312_v40  ;;  %v2313_v44 = vpack.c.bf16 %v613_v43, %v613_v43  ;;  %v2714_v45 = vpack.c.bf16 %v613_v43, %v610_v39  ;;  %2627 = vmatmul.mubr.msk.f32.gmra.mrb[24].mxu1 %vm1092_vm2, %v613_v43 }
 0x124   : > { %1053 = vst.msk [vmem:[%s3096_s29 + $0x6c] sm:$0xf] %vm1025_vm3, %v2315_v38  ;;  %2629 = vmatprep.mubr.msk.f32.mxu1 %vm1092_vm2, %v3292_v36 }
 0x125   : > { %1051 = vst.msk [vmem:[%s3096_s29 + $0x64] sm:$0xf] %vm1025_vm3, %v2313_v44 }
 0x126   : > { %2707 = vmatpush3.bf16.xpose.msk.msra.mxu0 %vm3247_vm4, %v2705_v57 }
 0x127   : > { %v3317_v46 = vpop.f32.mrb[28].mxu0  ;;  %2630 = vmatmul.mubr.msk.f32.gmra.mrb[26].mxu1 %vm1092_vm2, %v2549_v41  ;;  %2710 = vmatprep.subr.msk.bf16.mxu0 %vm3247_vm4, %v2708_v32 }
 0x128   : > { %v2318_v47 = vpack.c.bf16 %v3317_v46, %v3317_v46  ;;  %v626_v49 = vpop.f32.mrb[29].mxu0 }
 0x129   : > { %v2316_v51 = vpack.c.bf16 %v626_v49, %v626_v49  ;;  %v3324_v53 = vpop.f32.mrb[30].mxu0  ;;  %2632 = vmatprep.mubr.msk.f32.mxu1 %vm1092_vm2, %v626_v49 }
 0x12a   : > { %1056 = vst.msk [vmem:[%s3096_s29 + $0x78] sm:$0xf] %vm1025_vm3, %v2318_v47  ;;  %v2319_v50 = vpack.c.bf16 %v3324_v53, %v3324_v53  ;;  %v2732_v55 = vpack.c.bf16 %v3324_v53, %v3317_v46  ;;  %v629_v56 = vpop.f32.mrb[31].mxu0 }
 0x12b   : > { %1054 = vst.msk [vmem:[%s3096_s29 + $0x70] sm:$0xf] %vm1025_vm3, %v2316_v51  ;;  %v2317_v57 = vpack.c.bf16 %v629_v56, %v629_v56  ;;  %v2726_v59 = vpack.c.bf16 %v629_v56, %v626_v49  ;;  %2633 = vmatmul.mubr.msk.f32.gmra.mrb[28].mxu1 %vm1092_vm2, %v629_v56 }
 0x12c   : > { %1057 = vst.msk [vmem:[%s3096_s29 + $0x7c] sm:$0xf] %vm1025_vm3, %v2319_v50  ;;  %2635 = vmatprep.mubr.msk.f32.mxu1 %vm1092_vm2, %v3317_v46 }
 0x12d   : > { %1055 = vst.msk [vmem:[%s3096_s29 + $0x74] sm:$0xf] %vm1025_vm3, %v2317_v57 }
 0x12e   : > { %2713 = vmatpush3.bf16.xpose.msk.msra.mxu0 %vm3247_vm4, %v2711_v54 }
 0x12f   : > { %v3347_v61 = vpop.f32.mrb[32].mxu0  ;;  %2636 = vmatmul.mubr.msk.f32.gmra.mrb[30].mxu1 %vm1092_vm2, %v3324_v53  ;;  %2716 = vmatprep.subr.msk.bf16.mxu0 %vm3247_vm4, %v2714_v45 }
 0x130   : > { %v2322_v63 = vpack.c.bf16 %v3347_v61, %v3347_v61  ;;  %v3355_v2 = vpop.f32.mrb[33].mxu0 }
 0x131   : > { %v2320_v48 = vpack.c.bf16 %v3355_v2, %v3355_v2  ;;  %v3359_v52 = vpop.f32.mrb[34].mxu0  ;;  %2638 = vmatprep.mubr.msk.f32.mxu1 %vm1092_vm2, %v3355_v2 }
 0x132   : > { %1060 = vst.msk [vmem:[%s3096_s29 + $0x88] sm:$0xf] %vm1025_vm3, %v2322_v63  ;;  %v2323_v54 = vpack.c.bf16 %v3359_v52, %v3359_v52  ;;  %v2747_v5 = vpack.c.bf16 %v3359_v52, %v3347_v61  ;;  %v3369_v7 = vpop.f32.mrb[35].mxu0 }
 0x133   : > { %1058 = vst.msk [vmem:[%s3096_s29 + $0x80] sm:$0xf] %vm1025_vm3, %v2320_v48  ;;  %v2321_v9 = vpack.c.bf16 %v3369_v7, %v3369_v7  ;;  %v2741_v12 = vpack.c.bf16 %v3369_v7, %v3355_v2  ;;  %2639 = vmatmul.mubr.msk.f32.gmra.mrb[32].mxu1 %vm1092_vm2, %v3369_v7 }
 0x134   : > { %1061 = vst.msk [vmem:[%s3096_s29 + $0x8c] sm:$0xf] %vm1025_vm3, %v2323_v54  ;;  %2641 = vmatprep.mubr.msk.f32.mxu1 %vm1092_vm2, %v3347_v61 }
 0x135   : > { %1059 = vst.msk [vmem:[%s3096_s29 + $0x84] sm:$0xf] %vm1025_vm3, %v2321_v9 }
 0x136   : > { %2719 = vmatpush3.bf16.xpose.msk.msra.mxu0 %vm3247_vm4, %v2717_v3 }
 0x137   : > { %v3390_v14 = vpop.f32.mrb[36].mxu0  ;;  %2642 = vmatmul.mubr.msk.f32.gmra.mrb[34].mxu1 %vm1092_vm2, %v3359_v52  ;;  %2722 = vmatprep.subr.msk.bf16.mxu0 %vm3247_vm4, %v2720_v42 }
 0x138   : > { %v2326_v15 = vpack.c.bf16 %v3390_v14, %v3390_v14  ;;  %v3398_v16 = vpop.f32.mrb[37].mxu0 }
 0x139   : > { %v2324_v60 = vpack.c.bf16 %v3398_v16, %v3398_v16  ;;  %v3402_v1 = vpop.f32.mrb[38].mxu0  ;;  %2644 = vmatprep.mubr.msk.f32.mxu1 %vm1092_vm2, %v3398_v16 }
 0x13a   : > { %1064 = vst.msk [vmem:[%s3096_s29 + $0x98] sm:$0xf] %vm1025_vm3, %v2326_v15  ;;  %v2327_v3 = vpack.c.bf16 %v3402_v1, %v3402_v1  ;;  %v2759_v17 = vpack.c.bf16 %v3402_v1, %v3390_v14  ;;  %v3412_v18 = vpop.f32.mrb[39].mxu0 }
 0x13b   : > { %1062 = vst.msk [vmem:[%s3096_s29 + $0x90] sm:$0xf] %vm1025_vm3, %v2324_v60  ;;  %v2325_v19 = vpack.c.bf16 %v3412_v18, %v3412_v18  ;;  %v2753_v20 = vpack.c.bf16 %v3412_v18, %v3398_v16  ;;  %2645 = vmatmul.mubr.msk.f32.gmra.mrb[36].mxu1 %vm1092_vm2, %v3412_v18 }
 0x13c   : > { %1065 = vst.msk [vmem:[%s3096_s29 + $0x9c] sm:$0xf] %vm1025_vm3, %v2327_v3  ;;  %2647 = vmatprep.mubr.msk.f32.mxu1 %vm1092_vm2, %v3390_v14 }
 0x13d   : > { %1063 = vst.msk [vmem:[%s3096_s29 + $0x94] sm:$0xf] %vm1025_vm3, %v2325_v19 }
 0x13e   : > { %2725 = vmatpush3.bf16.xpose.msk.msra.mxu0 %vm3247_vm4, %v2723_v0 }
 0x13f   : > { %v3433_v21 = vpop.f32.mrb[40].mxu0  ;;  %2648 = vmatmul.mubr.msk.f32.gmra.mrb[38].mxu1 %vm1092_vm2, %v3402_v1  ;;  %2728 = vmatprep.subr.msk.bf16.mxu0 %vm3247_vm4, %v2726_v59 }
 0x140   : > { %v2330_v24 = vpack.c.bf16 %v3433_v21, %v3433_v21  ;;  %v3441_v25 = vpop.f32.mrb[41].mxu0 }
 0x141   : > { %v2328_v58 = vpack.c.bf16 %v3441_v25, %v3441_v25  ;;  %v3445_v62 = vpop.f32.mrb[42].mxu0  ;;  %2650 = vmatprep.mubr.msk.f32.mxu1 %vm1092_vm2, %v3441_v25 }
 0x142   : > { %1068 = vst.msk [vmem:[%s3096_s29 + $0xa8] sm:$0xf] %vm1025_vm3, %v2330_v24  ;;  %v2331_v0 = vpack.c.bf16 %v3445_v62, %v3445_v62  ;;  %v2771_v26 = vpack.c.bf16 %v3445_v62, %v3433_v21  ;;  %v3455_v27 = vpop.f32.mrb[43].mxu0 }
 0x143   : > { %1066 = vst.msk [vmem:[%s3096_s29 + $0xa0] sm:$0xf] %vm1025_vm3, %v2328_v58  ;;  %v2329_v28 = vpack.c.bf16 %v3455_v27, %v3455_v27  ;;  %v2765_v29 = vpack.c.bf16 %v3455_v27, %v3441_v25  ;;  %2651 = vmatmul.mubr.msk.f32.gmra.mrb[40].mxu1 %vm1092_vm2, %v3455_v27 }
 0x144   : > { %1069 = vst.msk [vmem:[%s3096_s29 + $0xac] sm:$0xf] %vm1025_vm3, %v2331_v0  ;;  %2653 = vmatprep.mubr.msk.f32.mxu1 %vm1092_vm2, %v3433_v21 }
 0x145   : > { %1067 = vst.msk [vmem:[%s3096_s29 + $0xa4] sm:$0xf] %vm1025_vm3, %v2329_v28 }
 0x146   : > { %2731 = vmatpush3.bf16.xpose.msk.msra.mxu0 %vm3247_vm4, %v2729_v13 }
 0x147   : > { %v3476_v30 = vpop.f32.mrb[44].mxu0  ;;  %2654 = vmatmul.mubr.msk.f32.gmra.mrb[42].mxu1 %vm1092_vm2, %v3445_v62  ;;  %2734 = vmatprep.subr.msk.bf16.mxu0 %vm3247_vm4, %v2732_v55 }
 0x148   : > { %v2334_v31 = vpack.c.bf16 %v3476_v30, %v3476_v30  ;;  %v3487_v6 = vpop.f32.mrb[45].mxu0 }
 0x149   : > { %v2332_v11 = vpack.c.bf16 %v3487_v6, %v3487_v6  ;;  %v3491_v13 = vpop.f32.mrb[46].mxu0  ;;  %2656 = vmatprep.mubr.msk.f32.mxu1 %vm1092_vm2, %v3487_v6 }
 0x14a   : > { %1072 = vst.msk [vmem:[%s3096_s29 + $0xb8] sm:$0xf] %vm1025_vm3, %v2334_v31  ;;  %v2335_v32 = vpack.c.bf16 %v3491_v13, %v3491_v13  ;;  %v2783_v33 = vpack.c.bf16 %v3491_v13, %v3476_v30  ;;  %v3501_v34 = vpop.f32.mrb[47].mxu0 }
 0x14b   : > { %1070 = vst.msk [vmem:[%s3096_s29 + $0xb0] sm:$0xf] %vm1025_vm3, %v2332_v11  ;;  %v2333_v35 = vpack.c.bf16 %v3501_v34, %v3501_v34  ;;  %v2777_v36 = vpack.c.bf16 %v3501_v34, %v3487_v6  ;;  %2657 = vmatmul.mubr.msk.f32.gmra.mrb[44].mxu1 %vm1092_vm2, %v3501_v34 }
 0x14c   : > { %1073 = vst.msk [vmem:[%s3096_s29 + $0xbc] sm:$0xf] %vm1025_vm3, %v2335_v32  ;;  %2659 = vmatprep.mubr.msk.f32.mxu1 %vm1092_vm2, %v3476_v30 }
 0x14d   : > { %1071 = vst.msk [vmem:[%s3096_s29 + $0xb4] sm:$0xf] %vm1025_vm3, %v2333_v35 }
 0x14e   : > { %2737 = vmatpush3.bf16.xpose.msk.msra.mxu0 %vm3247_vm4, %v2735_v10 }
 0x14f   : > { %v2572_v37 = vpop.f32.mrb[48].mxu0  ;;  %2660 = vmatmul.mubr.msk.f32.gmra.mrb[46].mxu1 %vm1092_vm2, %v3491_v13 }
 0x150   : > { %v2338_v39 = vpack.c.bf16 %v2572_v37, %v2572_v37  ;;  %v706_v40 = vpop.f32.mrb[49].mxu0 }
 0x151   : > { %v2336_v41 = vpack.c.bf16 %v706_v40, %v706_v40  ;;  %v2573_v38 = vpop.f32.mrb[50].mxu0  ;;  %2662 = vmatprep.mubr.msk.f32.mxu1 %vm1092_vm2, %v706_v40 }
 0x152   : > { %1076 = vst.msk [vmem:[%s3096_s29 + $0xc8] sm:$0xf] %vm1025_vm3, %v2338_v39  ;;  %v2339_v42 = vpack.c.bf16 %v2573_v38, %v2573_v38  ;;  %v2744_v43 = vpack.c.bf16 %v2573_v38, %v2572_v37  ;;  %v709_v4 = vpop.f32.mrb[51].mxu0 }
 0x153   : > { %1074 = vst.msk [vmem:[%s3096_s29 + $0xc0] sm:$0xf] %vm1025_vm3, %v2336_v41  ;;  %v2337_v8 = vpack.c.bf16 %v709_v4, %v709_v4  ;;  %v2738_v10 = vpack.c.bf16 %v709_v4, %v706_v40  ;;  %2663 = vmatmul.mubr.msk.f32.gmra.mrb[48].mxu1 %vm1092_vm2, %v709_v4 }
 0x154   : > { %1077 = vst.msk [vmem:[%s3096_s29 + $0xcc] sm:$0xf] %vm1025_vm3, %v2339_v42  ;;  %2665 = vmatprep.mubr.msk.f32.mxu1 %vm1092_vm2, %v2572_v37 }
 0x155   : > { %1075 = vst.msk [vmem:[%s3096_s29 + $0xc4] sm:$0xf] %vm1025_vm3, %v2337_v8  ;;  %2740 = vmatprep.subr.msk.bf16.mxu1 %vm3247_vm4, %v2738_v10  ;;  %2485 = vmatmul.mubr.msk.f32.vlgmr.msra.gmra.mrb[64].mxu0 %vm1092_vm2, %v3254_v23 }
 0x156   : > { %2743 = vmatpush3.bf16.xpose.msk.msra.mxu1 %vm3247_vm4, %v2741_v12 }
 0x157   : > { %2666 = vmatmul.mubr.msk.f32.gmra.mrb[50].mxu1 %vm1092_vm2, %v2573_v38  ;;  %2746 = vmatprep.subr.msk.bf16.mxu1 %vm3247_vm4, %v2744_v43  ;;  %v2576_v44 = vpop.f32.mrb[52].mxu0 }
 0x158   : > { %v2342_v45 = vpack.c.bf16 %v2576_v44, %v2576_v44  ;;  %v722_v46 = vpop.f32.mrb[53].mxu0 }
 0x159   : > { %v2340_v47 = vpack.c.bf16 %v722_v46, %v722_v46  ;;  %v2577_v49 = vpop.f32.mrb[54].mxu0  ;;  %2668 = vmatprep.mubr.msk.f32.mxu1 %vm1092_vm2, %v722_v46 }
 0x15a   : > { %1080 = vst.msk [vmem:[%s3096_s29 + $0xd8] sm:$0xf] %vm1025_vm3, %v2342_v45  ;;  %v2343_v51 = vpack.c.bf16 %v2577_v49, %v2577_v49  ;;  %v2756_v53 = vpack.c.bf16 %v2577_v49, %v2576_v44  ;;  %v725_v50 = vpop.f32.mrb[55].mxu0 }
 0x15b   : > { %1078 = vst.msk [vmem:[%s3096_s29 + $0xd0] sm:$0xf] %vm1025_vm3, %v2340_v47  ;;  %v2341_v55 = vpack.c.bf16 %v725_v50, %v725_v50  ;;  %v2750_v56 = vpack.c.bf16 %v725_v50, %v722_v46  ;;  %2669 = vmatmul.mubr.msk.f32.gmra.mrb[52].mxu1 %vm1092_vm2, %v725_v50 }
 0x15c   : > { %1081 = vst.msk [vmem:[%s3096_s29 + $0xdc] sm:$0xf] %vm1025_vm3, %v2343_v51  ;;  %2671 = vmatprep.mubr.msk.f32.mxu1 %vm1092_vm2, %v2576_v44 }
 0x15d   : > { %1079 = vst.msk [vmem:[%s3096_s29 + $0xd4] sm:$0xf] %vm1025_vm3, %v2341_v55 }
 0x15e   : > { %2749 = vmatpush3.bf16.xpose.msk.msra.mxu1 %vm3247_vm4, %v2747_v5 }
 0x15f   : > { %2752 = vmatprep.subr.msk.bf16.mxu1 %vm3247_vm4, %v2750_v56  ;;  %v2580_v57 = vpop.f32.mrb[56].mxu0  ;;  %2672 = vmatmul.mubr.msk.f32.gmra.mrb[54].mxu1 %vm1092_vm2, %v2577_v49 }
 0x160   : > { %v2346_v59 = vpack.c.bf16 %v2580_v57, %v2580_v57  ;;  %v738_v63 = vpop.f32.mrb[57].mxu0 }
 0x161   : > { %v2344_v2 = vpack.c.bf16 %v738_v63, %v738_v63  ;;  %v2581_v48 = vpop.f32.mrb[58].mxu0  ;;  %2674 = vmatprep.mubr.msk.f32.mxu1 %vm1092_vm2, %v738_v63 }
 0x162   : > { %1084 = vst.msk [vmem:[%s3096_s29 + $0xe8] sm:$0xf] %vm1025_vm3, %v2346_v59  ;;  %v2347_v61 = vpack.c.bf16 %v2581_v48, %v2581_v48  ;;  %v2768_v52 = vpack.c.bf16 %v2581_v48, %v2580_v57  ;;  %v741_v54 = vpop.f32.mrb[59].mxu0 }
 0x163   : > { %1082 = vst.msk [vmem:[%s3096_s29 + $0xe0] sm:$0xf] %vm1025_vm3, %v2344_v2  ;;  %v2345_v5 = vpack.c.bf16 %v741_v54, %v741_v54  ;;  %v2762_v7 = vpack.c.bf16 %v741_v54, %v738_v63  ;;  %2675 = vmatmul.mubr.msk.f32.gmra.mrb[56].mxu1 %vm1092_vm2, %v741_v54 }
 0x164   : > { %1085 = vst.msk [vmem:[%s3096_s29 + $0xec] sm:$0xf] %vm1025_vm3, %v2347_v61  ;;  %2677 = vmatprep.mubr.msk.f32.mxu1 %vm1092_vm2, %v2580_v57 }
 0x165   : > { %1083 = vst.msk [vmem:[%s3096_s29 + $0xe4] sm:$0xf] %vm1025_vm3, %v2345_v5 }
 0x166   : > { %2755 = vmatpush3.bf16.xpose.msk.msra.mxu1 %vm3247_vm4, %v2753_v20 }
 0x167   : > { %2758 = vmatprep.subr.msk.bf16.mxu1 %vm3247_vm4, %v2756_v53  ;;  %v2584_v9 = vpop.f32.mrb[60].mxu0  ;;  %2678 = vmatmul.mubr.msk.f32.gmra.mrb[58].mxu1 %vm1092_vm2, %v2581_v48 }
 0x168   : > { %v2350_v12 = vpack.c.bf16 %v2584_v9, %v2584_v9  ;;  %v754_v15 = vpop.f32.mrb[61].mxu0 }
 0x169   : > { %v2348_v60 = vpack.c.bf16 %v754_v15, %v754_v15  ;;  %v2585_v3 = vpop.f32.mrb[62].mxu0  ;;  %2680 = vmatprep.mubr.msk.f32.mxu1 %vm1092_vm2, %v754_v15 }
 0x16a   : > { %1088 = vst.msk [vmem:[%s3096_s29 + $0xf8] sm:$0xf] %vm1025_vm3, %v2350_v12  ;;  %v2351_v16 = vpack.c.bf16 %v2585_v3, %v2585_v3  ;;  %v2780_v18 = vpack.c.bf16 %v2585_v3, %v2584_v9  ;;  %v757_v19 = vpop.f32.mrb[63].mxu0 }
 0x16b   : > { %1086 = vst.msk [vmem:[%s3096_s29 + $0xf0] sm:$0xf] %vm1025_vm3, %v2348_v60  ;;  %v2349_v20 = vpack.c.bf16 %v757_v19, %v757_v19  ;;  %v2774_v24 = vpack.c.bf16 %v757_v19, %v754_v15  ;;  %2681 = vmatmul.mubr.msk.f32.gmra.mrb[60].mxu1 %vm1092_vm2, %v757_v19 }
 0x16c   : > { %1089 = vst.msk [vmem:[%s3096_s29 + $0xfc] sm:$0xf] %vm1025_vm3, %v2351_v16  ;;  %2683 = vmatprep.mubr.msk.f32.mxu1 %vm1092_vm2, %v2584_v9 }
 0x16d   : > { %1087 = vst.msk [vmem:[%s3096_s29 + $0xf4] sm:$0xf] %vm1025_vm3, %v2349_v20  ;;  %s2827_s29 = scalar_lea.vmem %s3776_s18, 128 }
 0x16e   : > { %2761 = vmatpush3.bf16.xpose.msk.msra.mxu1 %vm3247_vm4, %v2759_v17  ;;  %p2828_p11 = scmp.ne.s32.totalorder %s3776_s18, %s2827_s29  ;;  %p2835_p1 = scmp.lt.s32.totalorder %s2833_s10, %s2827_s29 }
 0x16f   : > { %2764 = vmatprep.subr.msk.bf16.mxu1 %vm3247_vm4, %v2762_v7  ;;  %2684 = vmatmul.mubr.msk.f32.gmra.mrb[62].mxu1 %vm1092_vm2, %v2585_v3 }
 0x170   : > { %2518 = vmatprep.mubr.msk.f32.mxu1 %vm1092_vm2, %v3254_v23  ;;  %p2829_p12 = pnand %p2828_p11, %p2966_p5  ;;  %p2836_p2 = por %p2835_p1, %p2834_p0 }
 0x172   : > { %p2830_p13 = pneg %p2829_p12 }
 0x174   : > { %p2837_p3 = pnand %p2836_p2, %p2830_p13 }
 0x176   : > { %2767 = vmatpush3.bf16.xpose.msk.msra.mxu1 %vm3247_vm4, %v2765_v29 }
 0x177   : > { %2770 = vmatprep.subr.msk.bf16.mxu1 %vm3247_vm4, %v2768_v52 }
 0x17e   : > { %2773 = vmatpush3.bf16.xpose.msk.msra.mxu1 %vm3247_vm4, %v2771_v26 }
 0x17f   : > { %2776 = vmatprep.subr.msk.bf16.mxu1 %vm3247_vm4, %v2774_v24 }
 0x186   : > { %2779 = vmatpush3.bf16.xpose.msk.msra.mxu1 %vm3247_vm4, %v2777_v36 }
 0x187   : > { %2782 = vmatprep.subr.msk.bf16.mxu1 %vm3247_vm4, %v2780_v18 }
 0x18e   : > { %2785 = vmatpush3.bf16.xpose.msk.msra.mxu1 %vm3247_vm4, %v2783_v33 }
 0x195   : > { %2519 = vmatmul.mubr.msk.f32.vlgmr.msra.gmra.mrb[64].mxu1 %vm1092_vm2, %v3254_v23 }
 0x1c6   : > { %v2592_v22 = vpop.f32.mrb[0].mxu1 }
 0x1c7   : > { %1672 = vst.msk [vmem:[%s3639_s15 + $0x8] sm:$0xff] %vm1670_vm5, %v2592_v22  ;;  %v1351_v23 = vpop.f32.mrb[1].mxu1 }
 0x1c8   : > { %1671 = vst.msk [vmem:[%s3639_s15] sm:$0xff] %vm1670_vm5, %v1351_v23 }
 0x1ca   : > { %v2595_v14 = vpop.f32.mrb[2].mxu1 }
 0x1cb   : > { %1674 = vst.msk [vmem:[%s3639_s15 + $0x18] sm:$0xff] %vm1670_vm5, %v2595_v14  ;;  %v1361_v1 = vpop.f32.mrb[3].mxu1 }
 0x1cc   : > { %1673 = vst.msk [vmem:[%s3639_s15 + $0x10] sm:$0xff] %vm1670_vm5, %v1361_v1  ;;  %v2891_v1 = vmov 1983009808  }
 0x1ce   : > { %v2598_v17 = vpop.f32.mrb[4].mxu1 }
 0x1cf   : > { %1676 = vst.msk [vmem:[%s3639_s15 + $0x28] sm:$0xff] %vm1670_vm5, %v2598_v17  ;;  %v1371_v21 = vpop.f32.mrb[5].mxu1  ;;  %v1888_v17 = vunpack.c.l.s4 %v2891_v1 }
 0x1d0   : > { %1675 = vst.msk [vmem:[%s3639_s15 + $0x20] sm:$0xff] %vm1670_vm5, %v1371_v21  ;;  %v1890_v21 = vlaneseq }
 0x1d2   : > { %v2601_v25 = vpop.f32.mrb[6].mxu1 }
 0x1d3   : > { %1678 = vst.msk [vmem:[%s3639_s15 + $0x38] sm:$0xff] %vm1670_vm5, %v2601_v25  ;;  %v1381_v58 = vpop.f32.mrb[7].mxu1  ;;  %v1889_v25 = vunpack.c.0.s8 %v1888_v17 }
 0x1d4   : > { %1677 = vst.msk [vmem:[%s3639_s15 + $0x30] sm:$0xff] %vm1670_vm5, %v1381_v58  ;;  %v1891_v58 = vshrl.u32 %v1890_v21, 7 }
 0x1d6   : > { %v2604_v62 = vpop.f32.mrb[8].mxu1 }
 0x1d7   : > { %1680 = vst.msk [vmem:[%s3639_s15 + $0x48] sm:$0xff] %vm1670_vm5, %v2604_v62  ;;  %v1391_v0 = vpop.f32.mrb[9].mxu1  ;;  %v1892_v62 = vsub.s32 %v1889_v25, %v1891_v58 }
 0x1d8   : > { %1679 = vst.msk [vmem:[%s3639_s15 + $0x40] sm:$0xff] %vm1670_vm5, %v1391_v0 }
 0x1da   : > { %v2607_v26 = vpop.f32.mrb[10].mxu1 }
 0x1db   : > { %1682 = vst.msk [vmem:[%s3639_s15 + $0x58] sm:$0xff] %vm1670_vm5, %v2607_v26  ;;  %v1401_v27 = vpop.f32.mrb[11].mxu1 }
 0x1dc   : > { %1681 = vst.msk [vmem:[%s3639_s15 + $0x50] sm:$0xff] %vm1670_vm5, %v1401_v27 }
 0x1de   : > { %v2610_v28 = vpop.f32.mrb[12].mxu1 }
 0x1df   : > { %1684 = vst.msk [vmem:[%s3639_s15 + $0x68] sm:$0xff] %vm1670_vm5, %v2610_v28  ;;  %v1411_v29 = vpop.f32.mrb[13].mxu1 }
 0x1e0   : > { %1683 = vst.msk [vmem:[%s3639_s15 + $0x60] sm:$0xff] %vm1670_vm5, %v1411_v29 }
 0x1e2   : > { %v2613_v30 = vpop.f32.mrb[14].mxu1 }
 0x1e3   : > { %1686 = vst.msk [vmem:[%s3639_s15 + $0x78] sm:$0xff] %vm1670_vm5, %v2613_v30  ;;  %v1421_v31 = vpop.f32.mrb[15].mxu1 }
 0x1e4   : > { %1685 = vst.msk [vmem:[%s3639_s15 + $0x70] sm:$0xff] %vm1670_vm5, %v1421_v31 }
 0x1e6   : > { %v2616_v6 = vpop.f32.mrb[16].mxu1 }
 0x1e7   : > { %1688 = vst.msk [vmem:[%s3639_s15 + $0x88] sm:$0xff] %vm1670_vm5, %v2616_v6  ;;  %v1431_v11 = vpop.f32.mrb[17].mxu1 }
 0x1e8   : > { %1687 = vst.msk [vmem:[%s3639_s15 + $0x80] sm:$0xff] %vm1670_vm5, %v1431_v11 }
 0x1ea   : > { %v2619_v13 = vpop.f32.mrb[18].mxu1 }
 0x1eb   : > { %1690 = vst.msk [vmem:[%s3639_s15 + $0x98] sm:$0xff] %vm1670_vm5, %v2619_v13  ;;  %v1441_v32 = vpop.f32.mrb[19].mxu1 }
 0x1ec   : > { %1689 = vst.msk [vmem:[%s3639_s15 + $0x90] sm:$0xff] %vm1670_vm5, %v1441_v32 }
 0x1ee   : > { %v2622_v33 = vpop.f32.mrb[20].mxu1 }
 0x1ef   : > { %1692 = vst.msk [vmem:[%s3639_s15 + $0xa8] sm:$0xff] %vm1670_vm5, %v2622_v33  ;;  %v1451_v34 = vpop.f32.mrb[21].mxu1 }
 0x1f0   : > { %1691 = vst.msk [vmem:[%s3639_s15 + $0xa0] sm:$0xff] %vm1670_vm5, %v1451_v34 }
 0x1f2   : > { %v2625_v35 = vpop.f32.mrb[22].mxu1 }
 0x1f3   : > { %1694 = vst.msk [vmem:[%s3639_s15 + $0xb8] sm:$0xff] %vm1670_vm5, %v2625_v35  ;;  %v1461_v36 = vpop.f32.mrb[23].mxu1 }
 0x1f4   : > { %1693 = vst.msk [vmem:[%s3639_s15 + $0xb0] sm:$0xff] %vm1670_vm5, %v1461_v36 }
 0x1f6   : > { %v2628_v37 = vpop.f32.mrb[24].mxu1 }
 0x1f7   : > { %1696 = vst.msk [vmem:[%s3639_s15 + $0xc8] sm:$0xff] %vm1670_vm5, %v2628_v37  ;;  %v1471_v39 = vpop.f32.mrb[25].mxu1 }
 0x1f8   : > { %1695 = vst.msk [vmem:[%s3639_s15 + $0xc0] sm:$0xff] %vm1670_vm5, %v1471_v39 }
 0x1fa   : > { %v2631_v40 = vpop.f32.mrb[26].mxu1 }
 0x1fb   : > { %1698 = vst.msk [vmem:[%s3639_s15 + $0xd8] sm:$0xff] %vm1670_vm5, %v2631_v40  ;;  %v1481_v41 = vpop.f32.mrb[27].mxu1 }
 0x1fc   : > { %1697 = vst.msk [vmem:[%s3639_s15 + $0xd0] sm:$0xff] %vm1670_vm5, %v1481_v41 }
 0x1fe   : > { %v2634_v38 = vpop.f32.mrb[28].mxu1 }
 0x1ff   : > { %1700 = vst.msk [vmem:[%s3639_s15 + $0xe8] sm:$0xff] %vm1670_vm5, %v2634_v38  ;;  %v1491_v42 = vpop.f32.mrb[29].mxu1 }
 0x200   : > { %1699 = vst.msk [vmem:[%s3639_s15 + $0xe0] sm:$0xff] %vm1670_vm5, %v1491_v42 }
 0x202   : > { %v2637_v43 = vpop.f32.mrb[30].mxu1 }
 0x203   : > { %1702 = vst.msk [vmem:[%s3639_s15 + $0xf8] sm:$0xff] %vm1670_vm5, %v2637_v43  ;;  %v1501_v4 = vpop.f32.mrb[31].mxu1 }
 0x204   : > { %1701 = vst.msk [vmem:[%s3639_s15 + $0xf0] sm:$0xff] %vm1670_vm5, %v1501_v4 }
 0x206   : > { %v2640_v8 = vpop.f32.mrb[32].mxu1 }
 0x207   : > { %1704 = vst.msk [vmem:[%s3639_s15 + $0x108] sm:$0xff] %vm1670_vm5, %v2640_v8  ;;  %v1511_v10 = vpop.f32.mrb[33].mxu1 }
 0x208   : > { %1703 = vst.msk [vmem:[%s3639_s15 + $0x100] sm:$0xff] %vm1670_vm5, %v1511_v10 }
 0x20a   : > { %v2643_v44 = vpop.f32.mrb[34].mxu1 }
 0x20b   : > { %1706 = vst.msk [vmem:[%s3639_s15 + $0x118] sm:$0xff] %vm1670_vm5, %v2643_v44  ;;  %v1521_v45 = vpop.f32.mrb[35].mxu1 }
 0x20c   : > { %1705 = vst.msk [vmem:[%s3639_s15 + $0x110] sm:$0xff] %vm1670_vm5, %v1521_v45 }
 0x20e   : > { %v2646_v46 = vpop.f32.mrb[36].mxu1 }
 0x20f   : > { %1708 = vst.msk [vmem:[%s3639_s15 + $0x128] sm:$0xff] %vm1670_vm5, %v2646_v46  ;;  %v1531_v47 = vpop.f32.mrb[37].mxu1 }
 0x210   : > { %1707 = vst.msk [vmem:[%s3639_s15 + $0x120] sm:$0xff] %vm1670_vm5, %v1531_v47 }
 0x212   : > { %v2649_v49 = vpop.f32.mrb[38].mxu1 }
 0x213   : > { %1710 = vst.msk [vmem:[%s3639_s15 + $0x138] sm:$0xff] %vm1670_vm5, %v2649_v49  ;;  %v1541_v51 = vpop.f32.mrb[39].mxu1 }
 0x214   : > { %1709 = vst.msk [vmem:[%s3639_s15 + $0x130] sm:$0xff] %vm1670_vm5, %v1541_v51 }
 0x216   : > { %v2652_v53 = vpop.f32.mrb[40].mxu1 }
 0x217   : > { %1712 = vst.msk [vmem:[%s3639_s15 + $0x148] sm:$0xff] %vm1670_vm5, %v2652_v53  ;;  %v1551_v50 = vpop.f32.mrb[41].mxu1 }
 0x218   : > { %1711 = vst.msk [vmem:[%s3639_s15 + $0x140] sm:$0xff] %vm1670_vm5, %v1551_v50 }
 0x21a   : > { %v2655_v55 = vpop.f32.mrb[42].mxu1 }
 0x21b   : > { %1714 = vst.msk [vmem:[%s3639_s15 + $0x158] sm:$0xff] %vm1670_vm5, %v2655_v55  ;;  %v1561_v56 = vpop.f32.mrb[43].mxu1 }
 0x21c   : > { %1713 = vst.msk [vmem:[%s3639_s15 + $0x150] sm:$0xff] %vm1670_vm5, %v1561_v56 }
 0x21e   : > { %v2658_v57 = vpop.f32.mrb[44].mxu1 }
 0x21f   : > { %1716 = vst.msk [vmem:[%s3639_s15 + $0x168] sm:$0xff] %vm1670_vm5, %v2658_v57  ;;  %v1571_v59 = vpop.f32.mrb[45].mxu1 }
 0x220   : > { %1715 = vst.msk [vmem:[%s3639_s15 + $0x160] sm:$0xff] %vm1670_vm5, %v1571_v59 }
 0x222   : > { %v2661_v63 = vpop.f32.mrb[46].mxu1 }
 0x223   : > { %1718 = vst.msk [vmem:[%s3639_s15 + $0x178] sm:$0xff] %vm1670_vm5, %v2661_v63  ;;  %v1581_v2 = vpop.f32.mrb[47].mxu1 }
 0x224   : > { %1717 = vst.msk [vmem:[%s3639_s15 + $0x170] sm:$0xff] %vm1670_vm5, %v1581_v2 }
 0x226   : > { %v2664_v48 = vpop.f32.mrb[48].mxu1 }
 0x227   : > { %1720 = vst.msk [vmem:[%s3639_s15 + $0x188] sm:$0xff] %vm1670_vm5, %v2664_v48  ;;  %v1591_v61 = vpop.f32.mrb[49].mxu1 }
 0x228   : > { %1719 = vst.msk [vmem:[%s3639_s15 + $0x180] sm:$0xff] %vm1670_vm5, %v1591_v61  ;;  %v1805_v52 = vpop.f32.mrb[64].mxu0 }
 0x229   : > { %v1807_v54 = vpop.f32.mrb[65].mxu0 }
 0x22a   : > { %v2667_v5 = vpop.f32.mrb[50].mxu1  ;;  %v1885_v7 = vcombine.low %v1805_v52, %v1807_v54 }
 0x22b   : > { %1722 = vst.msk [vmem:[%s3639_s15 + $0x198] sm:$0xff] %vm1670_vm5, %v2667_v5  ;;  %v1601_v9 = vpop.f32.mrb[51].mxu1 }
 0x22c   : > { %1721 = vst.msk [vmem:[%s3639_s15 + $0x190] sm:$0xff] %vm1670_vm5, %v1601_v9  ;;  %v1893_v27 = vrot.slane %v1885_v7, %v1892_v62 }
 0x22e   : > { %v2670_v12 = vpop.f32.mrb[52].mxu1 }
 0x22f   : > { %1724 = vst.msk [vmem:[%s3639_s15 + $0x1a8] sm:$0xff] %vm1670_vm5, %v2670_v12  ;;  %v1611_v15 = vpop.f32.mrb[53].mxu1 }
 0x230   : > { %1723 = vst.msk [vmem:[%s3639_s15 + $0x1a0] sm:$0xff] %vm1670_vm5, %v1611_v15 }
 0x232   : > { %v2673_v60 = vpop.f32.mrb[54].mxu1 }
 0x233   : > { %1726 = vst.msk [vmem:[%s3639_s15 + $0x1b8] sm:$0xff] %vm1670_vm5, %v2673_v60  ;;  %v1621_v3 = vpop.f32.mrb[55].mxu1 }
 0x234   : > { %1725 = vst.msk [vmem:[%s3639_s15 + $0x1b0] sm:$0xff] %vm1670_vm5, %v1621_v3 }
 0x236   : > { %v2676_v16 = vpop.f32.mrb[56].mxu1 }
 0x237   : > { %1728 = vst.msk [vmem:[%s3639_s15 + $0x1c8] sm:$0xff] %vm1670_vm5, %v2676_v16  ;;  %v1631_v18 = vpop.f32.mrb[57].mxu1 }
 0x238   : > { %1727 = vst.msk [vmem:[%s3639_s15 + $0x1c0] sm:$0xff] %vm1670_vm5, %v1631_v18 }
 0x23a   : > { %v2679_v19 = vpop.f32.mrb[58].mxu1 }
 0x23b   : > { %1730 = vst.msk [vmem:[%s3639_s15 + $0x1d8] sm:$0xff] %vm1670_vm5, %v2679_v19  ;;  %v1641_v20 = vpop.f32.mrb[59].mxu1 }
 0x23c   : > { %1729 = vst.msk [vmem:[%s3639_s15 + $0x1d0] sm:$0xff] %vm1670_vm5, %v1641_v20 }
 0x23e   : > { %v2682_v24 = vpop.f32.mrb[60].mxu1 }
 0x23f   : > { %1732 = vst.msk [vmem:[%s3639_s15 + $0x1e8] sm:$0xff] %vm1670_vm5, %v2682_v24  ;;  %v1651_v22 = vpop.f32.mrb[61].mxu1 }
 0x240   : > { %1731 = vst.msk [vmem:[%s3639_s15 + $0x1e0] sm:$0xff] %vm1670_vm5, %v1651_v22 }
 0x242   : > { %v2685_v23 = vpop.f32.mrb[62].mxu1 }
 0x243   : > { %1734 = vst.msk [vmem:[%s3639_s15 + $0x1f8] sm:$0xff] %vm1670_vm5, %v2685_v23  ;;  %v1661_v14 = vpop.f32.mrb[63].mxu1 }
 0x244   : > { %1733 = vst.msk [vmem:[%s3639_s15 + $0x1f0] sm:$0xff] %vm1670_vm5, %v1661_v14 }
 0x268   : > { %v1876_v0 = vpop.f32.mrb[64].mxu1 }
 0x269   : > { %v1878_v26 = vpop.f32.mrb[65].mxu1 }
 0x26a   : > { %v1886_v28 = vcombine.low %v1876_v0, %v1878_v26 }
 0x26c   : > { %v1900_v29 = vrot.slane %v1886_v28, %v1892_v62 }
 0x26e   : > { %v1901_v30 = vcombine.low %v1893_v27, %v1900_v29 }
 0x270   : > { %1903 = vst [vmem:[%s260_s17] sm:$0xff] %v1901_v30 }
 0x271   : > { %2840 = shalt.err (!%p2837_p3)
}
 0x272   : > { %s2841_s13 = scalar_lea.hbm %s3774_s26, 128  ;;  %s2845_s11 = scalar_lea.hbm %s3822_s6, 256 }
 0x273   : > { %p2842_p4 = scmp.ne.s32.totalorder %s3774_s26, %s2841_s13  ;;  %p2846_p9 = scmp.lt.u32.totalorder %s3774_s26, %s3822_s6 }
 0x274   : > { %p2847_p10 = scmp.lt.u32.totalorder %s2845_s11, %s2841_s13  ;;  %p2849_p12 = scmp.lt.u32.totalorder %s2841_s13, %s3774_s26 }
 0x275   : > { %p2843_p7 = pnand %p2842_p4, %p2966_p5 }
 0x276   : > { %p2848_p11 = por %p2847_p10, %p2846_p9 }
 0x277   : > { %p2844_p8 = pneg %p2843_p7 }
 0x278   : > { %p2850_p13 = por %p2849_p12, %p2848_p11 }
 0x27a   : > { %p2851_p0 = pnand %p2850_p13, %p2844_p8 }
 0x27c   : > { %2854 = shalt.err (!%p2851_p0)
}
 0x27d   : > { %2787 = dma.vmem_to_hbm [thread:$0]  (%p2966_p5), %s3776_s18, 128, %s3774_s26, %s1915_s28  }
 0x27e PF: > { %p2793_p1 = scmp.ge.s32.totalorder %s2889_s24, 2  ;;  %s1965_s17 = sand.u32 1, %s2877_s21  }
 0x27f   : > { %s1966_s19 = scalar_lea.sflag [#allocation3], %s1965_s17 }
 0x280   : > { %p2790_p2 = pnand %p2793_p1, %p2970_p6 }
 0x282   : > { %2872 = dma.done.wait (!%p2790_p2), %s1966_s19, 128  }
 0x283   : > { %2874 = vsyncadd (!%p2790_p2), %s1966_s19, 4294967168  ;;  %p17_p3 = scmp.ge.s32.totalorder %s2953_s27, 4   ;;  %s3827_s21 = smov %s2881_s22 }
 0x284   : > { %s3828_s22 = smov %s2885_s23  ;;  %s3829_s23 = smov %s2964_s30 }
 0x285   : > { %s3830_s24 = smov %s2953_s27  ;;  %19 = sbr.rel (!%p17_p3) target bundleno = 3 (0x3), region = 95 }
 0x28c   :  { %1971 = vsyncpa [#allocation3], 1 }
 0x28d   :  { %1973 = vsyncpa [#allocation3 + $0x1], 1 }

</bundles_post_ra>
